<compile_context>
chip_gen: v6e
topology: v6e:2x2x1
jax: 0.10.0
libtpu: 0.0.40
codegen_flags: <defaults>
</compile_context>

<pallas_src>
import jax
import jax.numpy as jnp
import numpy as np
from jax import lax
from jax.experimental import pallas as pl
from jax.experimental.pallas import tpu as pltpu


# ---------------------------------------------------------------------------
# Fused decoder kernel: one time-chunk per grid step (serial carry in VMEM)
# ---------------------------------------------------------------------------
def _seq_decoder_kernel(emb_ref, lens_ref, z_ref, wth_ref, bth_ref,
                        wih_ref, gbias_ref, whh_ref, bhhn_ref,
                        wv_ref, bv_ref,
                        out_ref,
                        h_scr, gx_scr, hbuf_scr):
    chunk = pl.program_id(0)
    TCB = emb_ref.shape[0]
    B_pad, H = h_scr.shape
    TC = TCB // B_pad

    # chunk 0: initial hidden h0 = tohidden(zsample). The module keeps zsample
    # in ORIGINAL batch order while sequences are length-sorted (reproduced).
    @pl.when(chunk == 0)
    def _():
        h_scr[...] = (jnp.dot(z_ref[...], wth_ref[...],
                              preferred_element_type=jnp.float32)
                      + bth_ref[...])

    # Input projection for the whole chunk: one bf16 MXU matmul, f32 accumulate.
    # b_ih and b_hh[r,z] are already folded into gbias.
    gx_scr[...] = (jnp.dot(emb_ref[...], wih_ref[...],
                           preferred_element_type=jnp.float32)
                   + gbias_ref[...])

    whh = whh_ref[...]                                     # (H, 3H) bf16
    bhh_n = jnp.broadcast_to(bhhn_ref[...], (B_pad, H))    # hoisted out of loop
    lens = lens_ref[...]                                   # (B_pad, H) int32
    t0 = chunk * TC

    def gru_step(gx, h):
        # bf16 only on the MXU operands; gates stay f32.
        gh = jnp.dot(h.astype(jnp.bfloat16), whh,
                     preferred_element_type=jnp.float32)
        r = jax.nn.sigmoid(gx[:, :H] + gh[:, :H])
        z = jax.nn.sigmoid(gx[:, H:2 * H] + gh[:, H:2 * H])
        n = jnp.tanh(gx[:, 2 * H:] + r * (gh[:, 2 * H:] + bhh_n))
        return (1.0 - z) * n + z * h

    h = h_scr[...]
    if TC <= 8:
        # small chunk: full static unroll (static addressing into gx_scr)
        for i in range(TC):
            gx = gx_scr[i * B_pad:(i + 1) * B_pad, :]
            h = gru_step(gx, h)
            # packed-sequence semantics: outputs at t >= length are zero (the
            # state never feeds a valid output again, so no freeze is needed).
            hbuf_scr[i * B_pad:(i + 1) * B_pad, :] = jnp.where(
                t0 + i < lens, h, 0.0)
    else:
        def body(i, h):
            off = pl.multiple_of(i * B_pad, B_pad)
            gx = gx_scr[pl.ds(off, B_pad), :]
            h = gru_step(gx, h)
            hbuf_scr[pl.ds(off, B_pad), :] = jnp.where(t0 + i < lens, h, 0.0)
            return h
        h = lax.fori_loop(0, TC, body, h, unroll=8)
    h_scr[...] = h                                         # carry to next chunk

    # outputs2vocab + log_softmax, fused (lane-dense V). bf16 MXU operands,
    # f32 accumulation and f32 softmax arithmetic.
    logits = (jnp.dot(hbuf_scr[...].astype(jnp.bfloat16), wv_ref[...],
                      preferred_element_type=jnp.float32) + bv_ref[...])
    m = jnp.max(logits, axis=-1, keepdims=True)
    lse = jnp.log(jnp.sum(jnp.exp(logits - m), axis=-1, keepdims=True))
    out_ref[...] = logits - m - lse


# ---------------------------------------------------------------------------
# Forward pass (mirrors SeqDecoder.forward)
# ---------------------------------------------------------------------------
def seq_decoder_forward(params, zsample, sequence, lengths, *, t_chunk=32):
    B, T = sequence.shape
    E = params["embedding"].shape[1]
    H = params["whh_t"].shape[0]
    Z = params["w_th_t"].shape[0]
    V = params["w_voc_t"].shape[1]
    B_pad = ((B + 7) // 8) * 8             # fill the 8 sublanes of a vreg
    t_chunk = min(t_chunk, T)
    T_pad = pl.cdiv(T, t_chunk) * t_chunk  # pad instead of asserting
    TCB = t_chunk * B_pad

    # torch.sort(lengths, descending=True): sequences sorted, zsample is NOT.
    sorted_idx = jnp.argsort(-lengths)
    sorted_lengths = lengths[sorted_idx]
    input_sequence = sequence[sorted_idx]

    # gather in (T, B) order directly from a bf16 table: no (B,T,E) f32
    # materialization/relayout, half the gather bytes.
    # TODO(synk): word_dropout is applied as inference-mode identity (train-mode
    # RNG dropout is not modeled in the kernel).
    emb = jnp.take(params["embedding"].astype(jnp.bfloat16),
                   input_sequence.T, axis=0)                          # (T,B,E)
    emb = jnp.pad(emb, ((0, T_pad - T), (0, B_pad - B), (0, 0)))
    emb2d = emb.reshape(T_pad * B_pad, E)                             # lane-dense bf16

    lens_bh = jnp.broadcast_to(
        jnp.pad(sorted_lengths, (0, B_pad - B)).astype(jnp.int32)[:, None],
        (B_pad, H))
    z_pad = jnp.pad(zsample.astype(jnp.float32), ((0, B_pad - B), (0, 0)))

    gbias = (params["b_ih"]
             + jnp.concatenate([params["b_hh"][:2 * H],
                                jnp.zeros((H,), jnp.float32)]))[None, :]  # (1,3H)
    bhh_n = params["b_hh"][2 * H:][None, :]                               # (1,H)

    # explicit VMEM budget (double-buffered blocks + scratch, bf16 weights)
    blk = (2 * TCB * E * 2 + 2 * B_pad * H * 4 + 2 * B_pad * Z * 4
           + 2 * (Z * H + H) * 4
           + 2 * E * 3 * H * 2 + 2 * 3 * H * 4
           + 2 * H * 3 * H * 2 + 2 * H * 4
           + 2 * H * V * 2 + 2 * V * 4
           + 2 * TCB * V * 4)
    scr = B_pad * H * 4 + TCB * 3 * H * 4 + TCB * H * 4
    vmem_limit = int(min(max(2 * (blk + scr), 32 << 20), 64 << 20))

    num_chunks = T_pad // t_chunk
    logp2d = pl.pallas_call(
        _seq_decoder_kernel,
        out_shape=jax.ShapeDtypeStruct((T_pad * B_pad, V), jnp.float32),
        grid=(num_chunks,),
        in_specs=[
            pl.BlockSpec((TCB, E), lambda c: (c, 0)),        # embeddings (streamed)
            pl.BlockSpec((B_pad, H), lambda c: (0, 0)),      # sorted lengths
            pl.BlockSpec((B_pad, Z), lambda c: (0, 0)),      # zsample
            pl.BlockSpec((Z, H), lambda c: (0, 0)),          # tohidden weight^T
            pl.BlockSpec((1, H), lambda c: (0, 0)),          # tohidden bias
            pl.BlockSpec((E, 3 * H), lambda c: (0, 0)),      # w_ih^T (bf16)
            pl.BlockSpec((1, 3 * H), lambda c: (0, 0)),      # folded gate bias
            pl.BlockSpec((H, 3 * H), lambda c: (0, 0)),      # w_hh^T (bf16)
            pl.BlockSpec((1, H), lambda c: (0, 0)),          # b_hh_n
            pl.BlockSpec((H, V), lambda c: (0, 0)),          # outputs2vocab W^T (bf16)
            pl.BlockSpec((1, V), lambda c: (0, 0)),          # outputs2vocab bias
        ],
        out_specs=pl.BlockSpec((TCB, V), lambda c: (c, 0)),
        scratch_shapes=[
            pltpu.VMEM((B_pad, H), jnp.float32),             # GRU carry
            pltpu.VMEM((TCB, 3 * H), jnp.float32),           # gx for the chunk
            pltpu.VMEM((TCB, H), jnp.float32),               # masked hidden outputs
        ],
        compiler_params=pltpu.CompilerParams(
            dimension_semantics=("arbitrary",),              # serial time carry
            vmem_limit_bytes=vmem_limit),
    )(emb2d, lens_bh, z_pad,
      params["w_th_t"], params["b_th"][None, :],
      params["wih_t"].astype(jnp.bfloat16), gbias,
      params["whh_t"].astype(jnp.bfloat16), bhh_n,
      params["w_voc_t"].astype(jnp.bfloat16), params["b_voc"][None, :])

    # pad_packed_sequence pads to max(lengths); slice to it when lengths are
    # concrete (eager), otherwise keep T.
    # TODO(synk): under jit, max(lengths) is dynamic and the time dim stays T.
    try:
        S = int(jnp.max(lengths))
    except Exception:
        S = T

    # (T_pad*B_pad, V) -> (B, S, V) in sorted order, then undo the length sort
    # (padded_outputs[reversed_idx] in the module).
    logp = logp2d.reshape(T_pad, B_pad, V)[:S, :B].transpose(1, 0, 2)
    reversed_idx = jnp.argsort(sorted_idx)
    return logp[reversed_idx]


# ---------------------------------------------------------------------------
# Parameters (deterministic init, PyTorch-default-style scales)
# ---------------------------------------------------------------------------
def init_params(key, vocab_size, zsize, hidden_size, embedding_size):
    E, H, Z, V = embedding_size, hidden_size, zsize, vocab_size
    keys = jax.random.split(key, 9)

    def u(kk, shape, scale):
        return jax.random.uniform(kk, shape, jnp.float32, -scale, scale)

    kh = 1.0 / np.sqrt(H)
    kz = 1.0 / np.sqrt(Z)
    return dict(
        embedding=jax.random.normal(keys[0], (V, E), jnp.float32),
        wih_t=jnp.transpose(u(keys[1], (3 * H, E), kh)),   # (E,3H) gate order r,z,n
        whh_t=jnp.transpose(u(keys[2], (3 * H, H), kh)),   # (H,3H)
        b_ih=u(keys[3], (3 * H,), kh),
        b_hh=u(keys[4], (3 * H,), kh),
        w_voc_t=jnp.transpose(u(keys[5], (V, H), kh)),     # (H,V)
        b_voc=u(keys[6], (V,), kh),
        w_th_t=jnp.transpose(u(keys[7], (H, Z), kz)),      # (Z,H)
        b_th=u(keys[8], (H,), kz),
    )


# ---------------------------------------------------------------------------
# Pure-JAX f32 reference (correctness check only)
# ---------------------------------------------------------------------------
def _reference(params, zsample, sequence, lengths):
    B, T = sequence.shape
    H = params["whh_t"].shape[0]
    sorted_idx = jnp.argsort(-lengths)
    sorted_lengths = lengths[sorted_idx]
    emb = jnp.take(params["embedding"], sequence[sorted_idx], axis=0)   # (B,T,E)

    # Module quirk: initial hidden uses zsample in ORIGINAL order.
    h0 = zsample @ params["w_th_t"] + params["b_th"]
    wih_t, whh_t = params["wih_t"], params["whh_t"]
    b_ih, b_hh = params["b_ih"], params["b_hh"]

    def step(h, xt):
        x, t = xt
        gx = x @ wih_t + b_ih
        gh = h @ whh_t + b_hh
        r = jax.nn.sigmoid(gx[:, :H] + gh[:, :H])
        z = jax.nn.sigmoid(gx[:, H:2 * H] + gh[:, H:2 * H])
        n = jnp.tanh(gx[:, 2 * H:] + r * gh[:, 2 * H:])
        h_new = (1.0 - z) * n + z * h
        out = jnp.where((t < sorted_lengths)[:, None], h_new, 0.0)
        return h_new, out

    _, outs = jax.lax.scan(step, h0,
                           (jnp.transpose(emb, (1, 0, 2)), jnp.arange(T)))
    outs = jnp.transpose(outs, (1, 0, 2))                  # (B,T,H) sorted order
    voc = outs @ params["w_voc_t"] + params["b_voc"]
    logp = jax.nn.log_softmax(voc, axis=-1)
    return logp[jnp.argsort(sorted_idx)]


if __name__ == "__main__":
    # small TPU-friendly shapes: lane-dense vocab / hidden / embedding = 128
    vocab_size, E, H, Z = 128, 128, 128, 32
    B, T = 4, 8

    key = jax.random.PRNGKey(0)
    pkey, zkey, skey = jax.random.split(key, 3)
    params = init_params(pkey, vocab_size, Z, H, E)
    zsample = jax.random.normal(zkey, (B, Z), jnp.float32)
    sequence = jax.random.randint(skey, (B, T), 1, vocab_size, dtype=jnp.int32)
    # distinct lengths (unambiguous sort); max == T so padded time dim matches
    lengths = jnp.array([5, 8, 3, 6], dtype=jnp.int32)

    logp = seq_decoder_forward(params, zsample, sequence, lengths)
    jax.block_until_ready(logp)

    logp_ref = _reference(params, zsample, sequence, lengths)
    # kernel uses bf16 MXU operands (f32 accumulation) for the input projection,
    # recurrence and vocab matmul, so compare against the pure-f32 reference
    # with a loose tolerance.
    err = float(np.max(np.abs(np.asarray(logp) - np.asarray(logp_ref))))
    assert logp.shape == logp_ref.shape, (logp.shape, logp_ref.shape)
    assert err < 1e-1, f"max abs error vs f32 reference: {err}"
    print("KERNEL_OK")
</pallas_src>

<mosaic_0001>
module attributes {stable_mosaic.version = 11 : i64} {
  func.func @_seq_decoder_kernel(%arg0: i32, %arg1: memref<64x128xbf16, #tpu.memory_space<vmem>>, %arg2: memref<8x128xi32, #tpu.memory_space<vmem>>, %arg3: memref<8x32xf32, #tpu.memory_space<vmem>>, %arg4: memref<32x128xf32, #tpu.memory_space<vmem>>, %arg5: memref<1x128xf32, #tpu.memory_space<vmem>>, %arg6: memref<128x384xbf16, #tpu.memory_space<vmem>>, %arg7: memref<1x384xf32, #tpu.memory_space<vmem>>, %arg8: memref<128x384xbf16, #tpu.memory_space<vmem>>, %arg9: memref<1x128xf32, #tpu.memory_space<vmem>>, %arg10: memref<128x128xbf16, #tpu.memory_space<vmem>>, %arg11: memref<1x128xf32, #tpu.memory_space<vmem>>, %arg12: memref<64x128xf32, #tpu.memory_space<vmem>>, %arg13: memref<8x128xf32, #tpu.memory_space<vmem>>, %arg14: memref<64x384xf32, #tpu.memory_space<vmem>>, %arg15: memref<64x128xf32, #tpu.memory_space<vmem>>) attributes {dimension_semantics = [#tpu.dimension_semantics<arbitrary>], iteration_bounds = array<i64: 1>, scalar_prefetch = 0 : i64, scratch_operands = 3 : i64, tpu.core_type = #tpu.core_type<tc>, window_params = [{transform_indices = @transform_0, window_bounds = array<i64: 64, 128>}, {pipeline_mode = #tpu.pipeline_mode<synchronous>, transform_indices = @transform_1, window_bounds = array<i64: 8, 128>}, {pipeline_mode = #tpu.pipeline_mode<synchronous>, transform_indices = @transform_2, window_bounds = array<i64: 8, 32>}, {pipeline_mode = #tpu.pipeline_mode<synchronous>, transform_indices = @transform_3, window_bounds = array<i64: 32, 128>}, {pipeline_mode = #tpu.pipeline_mode<synchronous>, transform_indices = @transform_4, window_bounds = array<i64: 1, 128>}, {pipeline_mode = #tpu.pipeline_mode<synchronous>, transform_indices = @transform_5, window_bounds = array<i64: 128, 384>}, {pipeline_mode = #tpu.pipeline_mode<synchronous>, transform_indices = @transform_6, window_bounds = array<i64: 1, 384>}, {pipeline_mode = #tpu.pipeline_mode<synchronous>, transform_indices = @transform_7, window_bounds = array<i64: 128, 384>}, {pipeline_mode = #tpu.pipeline_mode<synchronous>, transform_indices = @transform_8, window_bounds = array<i64: 1, 128>}, {pipeline_mode = #tpu.pipeline_mode<synchronous>, transform_indices = @transform_9, window_bounds = array<i64: 128, 128>}, {pipeline_mode = #tpu.pipeline_mode<synchronous>, transform_indices = @transform_10, window_bounds = array<i64: 1, 128>}, {transform_indices = @transform_11, window_bounds = array<i64: 64, 128>}]} {
    %c0_i32 = arith.constant 0 : i32
    %0 = arith.cmpi eq, %arg0, %c0_i32 : i32
    %1 = arith.extui %0 : i1 to i32
    %c0_i32_0 = arith.constant 0 : i32
    %2 = arith.cmpi ne, %1, %c0_i32_0 : i32
    scf.if %2 {
      %c0_95 = arith.constant 0 : index
      %c0_96 = arith.constant 0 : index
      %326 = vector.load %arg3[%c0_95, %c0_96] : memref<8x32xf32, #tpu.memory_space<vmem>>, vector<8x32xf32>
      %c0_97 = arith.constant 0 : index
      %c0_98 = arith.constant 0 : index
      %327 = vector.load %arg4[%c0_97, %c0_98] : memref<32x128xf32, #tpu.memory_space<vmem>>, vector<32x128xf32>
      %cst_99 = arith.constant dense<0.000000e+00> : vector<8x128xf32>
      %328 = tpu.matmul %326, %327, %cst_99 {dimension_numbers = #tpu.dot_dimension_numbers<[1], [0], [0], [1], [0, 0, 1, 1], [], []>} : vector<8x32xf32>, vector<32x128xf32>, vector<8x128xf32> -> vector<8x128xf32>
      %c0_100 = arith.constant 0 : index
      %c0_101 = arith.constant 0 : index
      %329 = vector.load %arg5[%c0_100, %c0_101] : memref<1x128xf32, #tpu.memory_space<vmem>>, vector<1x128xf32>
      %330 = vector.broadcast %329 : vector<1x128xf32> to vector<8x128xf32>
      %331 = arith.addf %328, %330 : vector<8x128xf32>
      %c0_102 = arith.constant 0 : index
      %c0_103 = arith.constant 0 : index
      %332 = vector.load %arg13[%c0_102, %c0_103] : memref<8x128xf32, #tpu.memory_space<vmem>>, vector<8x128xf32>
      tpu.vector_store %arg13[%c0_102, %c0_103], %331 {strides = array<i32>} : memref<8x128xf32, #tpu.memory_space<vmem>>, vector<8x128xf32>,
    } else {
    }
    %c0 = arith.constant 0 : index
    %c0_1 = arith.constant 0 : index
    %3 = vector.load %arg1[%c0, %c0_1] : memref<64x128xbf16, #tpu.memory_space<vmem>>, vector<64x128xbf16>
    %c0_2 = arith.constant 0 : index
    %c0_3 = arith.constant 0 : index
    %4 = vector.load %arg6[%c0_2, %c0_3] : memref<128x384xbf16, #tpu.memory_space<vmem>>, vector<128x384xbf16>
    %cst = arith.constant dense<0.000000e+00> : vector<64x384xf32>
    %5 = tpu.matmul %3, %4, %cst {dimension_numbers = #tpu.dot_dimension_numbers<[1], [0], [0], [1], [0, 0, 1, 1], [], []>} : vector<64x128xbf16>, vector<128x384xbf16>, vector<64x384xf32> -> vector<64x384xf32>
    %c0_4 = arith.constant 0 : index
    %c0_5 = arith.constant 0 : index
    %6 = vector.load %arg7[%c0_4, %c0_5] : memref<1x384xf32, #tpu.memory_space<vmem>>, vector<1x384xf32>
    %7 = vector.broadcast %6 : vector<1x384xf32> to vector<64x384xf32>
    %8 = arith.addf %5, %7 : vector<64x384xf32>
    %c0_6 = arith.constant 0 : index
    %c0_7 = arith.constant 0 : index
    %9 = vector.load %arg14[%c0_6, %c0_7] : memref<64x384xf32, #tpu.memory_space<vmem>>, vector<64x384xf32>
    tpu.vector_store %arg14[%c0_6, %c0_7], %8 {strides = array<i32>} : memref<64x384xf32, #tpu.memory_space<vmem>>, vector<64x384xf32>,
    %c0_8 = arith.constant 0 : index
    %c0_9 = arith.constant 0 : index
    %10 = vector.load %arg8[%c0_8, %c0_9] : memref<128x384xbf16, #tpu.memory_space<vmem>>, vector<128x384xbf16>
    %c0_10 = arith.constant 0 : index
    %c0_11 = arith.constant 0 : index
    %11 = vector.load %arg9[%c0_10, %c0_11] : memref<1x128xf32, #tpu.memory_space<vmem>>, vector<1x128xf32>
    %12 = vector.shape_cast %11 : vector<1x128xf32> to vector<1x128xf32>
    %13 = vector.broadcast %12 : vector<1x128xf32> to vector<8x128xf32>
    %c0_12 = arith.constant 0 : index
    %c0_13 = arith.constant 0 : index
    %14 = vector.load %arg2[%c0_12, %c0_13] : memref<8x128xi32, #tpu.memory_space<vmem>>, vector<8x128xi32>
    %c8_i32 = arith.constant 8 : i32
    %15 = arith.muli %arg0, %c8_i32 : i32
    %c0_14 = arith.constant 0 : index
    %c0_15 = arith.constant 0 : index
    %16 = vector.load %arg13[%c0_14, %c0_15] : memref<8x128xf32, #tpu.memory_space<vmem>>, vector<8x128xf32>
    %c0_16 = arith.constant 0 : index
    %c0_17 = arith.constant 0 : index
    %17 = vector.load %arg14[%c0_16, %c0_17] : memref<64x384xf32, #tpu.memory_space<vmem>>, vector<8x384xf32>
    %18 = arith.truncf %16 : vector<8x128xf32> to vector<8x128xbf16>
    %cst_18 = arith.constant dense<0.000000e+00> : vector<8x384xf32>
    %19 = tpu.matmul %18, %10, %cst_18 {dimension_numbers = #tpu.dot_dimension_numbers<[1], [0], [0], [1], [0, 0, 1, 1], [], []>} : vector<8x128xbf16>, vector<128x384xbf16>, vector<8x384xf32> -> vector<8x384xf32>
    %20 = vector.extract_strided_slice %17 {offsets = [0, 0], sizes = [8, 128], strides = [1, 1]} : vector<8x384xf32> to vector<8x128xf32>
    %21 = vector.extract_strided_slice %19 {offsets = [0, 0], sizes = [8, 128], strides = [1, 1]} : vector<8x384xf32> to vector<8x128xf32>
    %22 = arith.addf %20, %21 : vector<8x128xf32>
    %23 = arith.negf %22 : vector<8x128xf32>
    %24 = math.exp %23 : vector<8x128xf32>
    %cst_19 = arith.constant 1.000000e+00 : f32
    %25 = vector.broadcast %cst_19 : f32 to vector<8x128xf32>
    %26 = arith.addf %25, %24 : vector<8x128xf32>
    %27 = arith.divf %25, %26 : vector<8x128xf32>
    %28 = vector.extract_strided_slice %17 {offsets = [0, 128], sizes = [8, 128], strides = [1, 1]} : vector<8x384xf32> to vector<8x128xf32>
    %29 = vector.extract_strided_slice %19 {offsets = [0, 128], sizes = [8, 128], strides = [1, 1]} : vector<8x384xf32> to vector<8x128xf32>
    %30 = arith.addf %28, %29 : vector<8x128xf32>
    %31 = arith.negf %30 : vector<8x128xf32>
    %32 = math.exp %31 : vector<8x128xf32>
    %cst_20 = arith.constant 1.000000e+00 : f32
    %33 = vector.broadcast %cst_20 : f32 to vector<8x128xf32>
    %34 = arith.addf %33, %32 : vector<8x128xf32>
    %35 = arith.divf %33, %34 : vector<8x128xf32>
    %36 = vector.extract_strided_slice %17 {offsets = [0, 256], sizes = [8, 128], strides = [1, 1]} : vector<8x384xf32> to vector<8x128xf32>
    %37 = vector.extract_strided_slice %19 {offsets = [0, 256], sizes = [8, 128], strides = [1, 1]} : vector<8x384xf32> to vector<8x128xf32>
    %38 = arith.addf %37, %13 : vector<8x128xf32>
    %39 = arith.mulf %27, %38 : vector<8x128xf32>
    %40 = arith.addf %36, %39 : vector<8x128xf32>
    %41 = math.tanh %40 : vector<8x128xf32>
    %cst_21 = arith.constant 1.000000e+00 : f32
    %42 = vector.broadcast %cst_21 : f32 to vector<8x128xf32>
    %43 = arith.subf %42, %35 : vector<8x128xf32>
    %44 = arith.mulf %43, %41 : vector<8x128xf32>
    %45 = arith.mulf %35, %16 : vector<8x128xf32>
    %46 = arith.addf %44, %45 : vector<8x128xf32>
    %c0_i32_22 = arith.constant 0 : i32
    %47 = arith.addi %15, %c0_i32_22 : i32
    %48 = vector.broadcast %47 : i32 to vector<8x128xi32>
    %49 = arith.cmpi slt, %48, %14 : vector<8x128xi32>
    %cst_23 = arith.constant 0.000000e+00 : f32
    %50 = vector.broadcast %cst_23 : f32 to vector<8x128xf32>
    %51 = arith.select %49, %46, %50 : vector<8x128xi1>, vector<8x128xf32>
    %c0_24 = arith.constant 0 : index
    %c0_25 = arith.constant 0 : index
    %52 = vector.load %arg15[%c0_24, %c0_25] : memref<64x128xf32, #tpu.memory_space<vmem>>, vector<8x128xf32>
    tpu.vector_store %arg15[%c0_24, %c0_25], %51 {strides = array<i32>} : memref<64x128xf32, #tpu.memory_space<vmem>>, vector<8x128xf32>,
    %c8 = arith.constant 8 : index
    %c0_26 = arith.constant 0 : index
    %53 = vector.load %arg14[%c8, %c0_26] : memref<64x384xf32, #tpu.memory_space<vmem>>, vector<8x384xf32>
    %54 = arith.truncf %46 : vector<8x128xf32> to vector<8x128xbf16>
    %cst_27 = arith.constant dense<0.000000e+00> : vector<8x384xf32>
    %55 = tpu.matmul %54, %10, %cst_27 {dimension_numbers = #tpu.dot_dimension_numbers<[1], [0], [0], [1], [0, 0, 1, 1], [], []>} : vector<8x128xbf16>, vector<128x384xbf16>, vector<8x384xf32> -> vector<8x384xf32>
    %56 = vector.extract_strided_slice %53 {offsets = [0, 0], sizes = [8, 128], strides = [1, 1]} : vector<8x384xf32> to vector<8x128xf32>
    %57 = vector.extract_strided_slice %55 {offsets = [0, 0], sizes = [8, 128], strides = [1, 1]} : vector<8x384xf32> to vector<8x128xf32>
    %58 = arith.addf %56, %57 : vector<8x128xf32>
    %59 = arith.negf %58 : vector<8x128xf32>
    %60 = math.exp %59 : vector<8x128xf32>
    %cst_28 = arith.constant 1.000000e+00 : f32
    %61 = vector.broadcast %cst_28 : f32 to vector<8x128xf32>
    %62 = arith.addf %61, %60 : vector<8x128xf32>
    %63 = arith.divf %61, %62 : vector<8x128xf32>
    %64 = vector.extract_strided_slice %53 {offsets = [0, 128], sizes = [8, 128], strides = [1, 1]} : vector<8x384xf32> to vector<8x128xf32>
    %65 = vector.extract_strided_slice %55 {offsets = [0, 128], sizes = [8, 128], strides = [1, 1]} : vector<8x384xf32> to vector<8x128xf32>
    %66 = arith.addf %64, %65 : vector<8x128xf32>
    %67 = arith.negf %66 : vector<8x128xf32>
    %68 = math.exp %67 : vector<8x128xf32>
    %cst_29 = arith.constant 1.000000e+00 : f32
    %69 = vector.broadcast %cst_29 : f32 to vector<8x128xf32>
    %70 = arith.addf %69, %68 : vector<8x128xf32>
    %71 = arith.divf %69, %70 : vector<8x128xf32>
    %72 = vector.extract_strided_slice %53 {offsets = [0, 256], sizes = [8, 128], strides = [1, 1]} : vector<8x384xf32> to vector<8x128xf32>
    %73 = vector.extract_strided_slice %55 {offsets = [0, 256], sizes = [8, 128], strides = [1, 1]} : vector<8x384xf32> to vector<8x128xf32>
    %74 = arith.addf %73, %13 : vector<8x128xf32>
    %75 = arith.mulf %63, %74 : vector<8x128xf32>
    %76 = arith.addf %72, %75 : vector<8x128xf32>
    %77 = math.tanh %76 : vector<8x128xf32>
    %cst_30 = arith.constant 1.000000e+00 : f32
    %78 = vector.broadcast %cst_30 : f32 to vector<8x128xf32>
    %79 = arith.subf %78, %71 : vector<8x128xf32>
    %80 = arith.mulf %79, %77 : vector<8x128xf32>
    %81 = arith.mulf %71, %46 : vector<8x128xf32>
    %82 = arith.addf %80, %81 : vector<8x128xf32>
    %c1_i32 = arith.constant 1 : i32
    %83 = arith.addi %15, %c1_i32 : i32
    %84 = vector.broadcast %83 : i32 to vector<8x128xi32>
    %85 = arith.cmpi slt, %84, %14 : vector<8x128xi32>
    %cst_31 = arith.constant 0.000000e+00 : f32
    %86 = vector.broadcast %cst_31 : f32 to vector<8x128xf32>
    %87 = arith.select %85, %82, %86 : vector<8x128xi1>, vector<8x128xf32>
    %c8_32 = arith.constant 8 : index
    %c0_33 = arith.constant 0 : index
    %88 = vector.load %arg15[%c8_32, %c0_33] : memref<64x128xf32, #tpu.memory_space<vmem>>, vector<8x128xf32>
    tpu.vector_store %arg15[%c8_32, %c0_33], %87 {strides = array<i32>} : memref<64x128xf32, #tpu.memory_space<vmem>>, vector<8x128xf32>,
    %c16 = arith.constant 16 : index
    %c0_34 = arith.constant 0 : index
    %89 = vector.load %arg14[%c16, %c0_34] : memref<64x384xf32, #tpu.memory_space<vmem>>, vector<8x384xf32>
    %90 = arith.truncf %82 : vector<8x128xf32> to vector<8x128xbf16>
    %cst_35 = arith.constant dense<0.000000e+00> : vector<8x384xf32>
    %91 = tpu.matmul %90, %10, %cst_35 {dimension_numbers = #tpu.dot_dimension_numbers<[1], [0], [0], [1], [0, 0, 1, 1], [], []>} : vector<8x128xbf16>, vector<128x384xbf16>, vector<8x384xf32> -> vector<8x384xf32>
    %92 = vector.extract_strided_slice %89 {offsets = [0, 0], sizes = [8, 128], strides = [1, 1]} : vector<8x384xf32> to vector<8x128xf32>
    %93 = vector.extract_strided_slice %91 {offsets = [0, 0], sizes = [8, 128], strides = [1, 1]} : vector<8x384xf32> to vector<8x128xf32>
    %94 = arith.addf %92, %93 : vector<8x128xf32>
    %95 = arith.negf %94 : vector<8x128xf32>
    %96 = math.exp %95 : vector<8x128xf32>
    %cst_36 = arith.constant 1.000000e+00 : f32
    %97 = vector.broadcast %cst_36 : f32 to vector<8x128xf32>
    %98 = arith.addf %97, %96 : vector<8x128xf32>
    %99 = arith.divf %97, %98 : vector<8x128xf32>
    %100 = vector.extract_strided_slice %89 {offsets = [0, 128], sizes = [8, 128], strides = [1, 1]} : vector<8x384xf32> to vector<8x128xf32>
    %101 = vector.extract_strided_slice %91 {offsets = [0, 128], sizes = [8, 128], strides = [1, 1]} : vector<8x384xf32> to vector<8x128xf32>
    %102 = arith.addf %100, %101 : vector<8x128xf32>
    %103 = arith.negf %102 : vector<8x128xf32>
    %104 = math.exp %103 : vector<8x128xf32>
    %cst_37 = arith.constant 1.000000e+00 : f32
    %105 = vector.broadcast %cst_37 : f32 to vector<8x128xf32>
    %106 = arith.addf %105, %104 : vector<8x128xf32>
    %107 = arith.divf %105, %106 : vector<8x128xf32>
    %108 = vector.extract_strided_slice %89 {offsets = [0, 256], sizes = [8, 128], strides = [1, 1]} : vector<8x384xf32> to vector<8x128xf32>
    %109 = vector.extract_strided_slice %91 {offsets = [0, 256], sizes = [8, 128], strides = [1, 1]} : vector<8x384xf32> to vector<8x128xf32>
    %110 = arith.addf %109, %13 : vector<8x128xf32>
    %111 = arith.mulf %99, %110 : vector<8x128xf32>
    %112 = arith.addf %108, %111 : vector<8x128xf32>
    %113 = math.tanh %112 : vector<8x128xf32>
    %cst_38 = arith.constant 1.000000e+00 : f32
    %114 = vector.broadcast %cst_38 : f32 to vector<8x128xf32>
    %115 = arith.subf %114, %107 : vector<8x128xf32>
    %116 = arith.mulf %115, %113 : vector<8x128xf32>
    %117 = arith.mulf %107, %82 : vector<8x128xf32>
    %118 = arith.addf %116, %117 : vector<8x128xf32>
    %c2_i32 = arith.constant 2 : i32
    %119 = arith.addi %15, %c2_i32 : i32
    %120 = vector.broadcast %119 : i32 to vector<8x128xi32>
    %121 = arith.cmpi slt, %120, %14 : vector<8x128xi32>
    %cst_39 = arith.constant 0.000000e+00 : f32
    %122 = vector.broadcast %cst_39 : f32 to vector<8x128xf32>
    %123 = arith.select %121, %118, %122 : vector<8x128xi1>, vector<8x128xf32>
    %c16_40 = arith.constant 16 : index
    %c0_41 = arith.constant 0 : index
    %124 = vector.load %arg15[%c16_40, %c0_41] : memref<64x128xf32, #tpu.memory_space<vmem>>, vector<8x128xf32>
    tpu.vector_store %arg15[%c16_40, %c0_41], %123 {strides = array<i32>} : memref<64x128xf32, #tpu.memory_space<vmem>>, vector<8x128xf32>,
    %c24 = arith.constant 24 : index
    %c0_42 = arith.constant 0 : index
    %125 = vector.load %arg14[%c24, %c0_42] : memref<64x384xf32, #tpu.memory_space<vmem>>, vector<8x384xf32>
    %126 = arith.truncf %118 : vector<8x128xf32> to vector<8x128xbf16>
    %cst_43 = arith.constant dense<0.000000e+00> : vector<8x384xf32>
    %127 = tpu.matmul %126, %10, %cst_43 {dimension_numbers = #tpu.dot_dimension_numbers<[1], [0], [0], [1], [0, 0, 1, 1], [], []>} : vector<8x128xbf16>, vector<128x384xbf16>, vector<8x384xf32> -> vector<8x384xf32>
    %128 = vector.extract_strided_slice %125 {offsets = [0, 0], sizes = [8, 128], strides = [1, 1]} : vector<8x384xf32> to vector<8x128xf32>
    %129 = vector.extract_strided_slice %127 {offsets = [0, 0], sizes = [8, 128], strides = [1, 1]} : vector<8x384xf32> to vector<8x128xf32>
    %130 = arith.addf %128, %129 : vector<8x128xf32>
    %131 = arith.negf %130 : vector<8x128xf32>
    %132 = math.exp %131 : vector<8x128xf32>
    %cst_44 = arith.constant 1.000000e+00 : f32
    %133 = vector.broadcast %cst_44 : f32 to vector<8x128xf32>
    %134 = arith.addf %133, %132 : vector<8x128xf32>
    %135 = arith.divf %133, %134 : vector<8x128xf32>
    %136 = vector.extract_strided_slice %125 {offsets = [0, 128], sizes = [8, 128], strides = [1, 1]} : vector<8x384xf32> to vector<8x128xf32>
    %137 = vector.extract_strided_slice %127 {offsets = [0, 128], sizes = [8, 128], strides = [1, 1]} : vector<8x384xf32> to vector<8x128xf32>
    %138 = arith.addf %136, %137 : vector<8x128xf32>
    %139 = arith.negf %138 : vector<8x128xf32>
    %140 = math.exp %139 : vector<8x128xf32>
    %cst_45 = arith.constant 1.000000e+00 : f32
    %141 = vector.broadcast %cst_45 : f32 to vector<8x128xf32>
    %142 = arith.addf %141, %140 : vector<8x128xf32>
    %143 = arith.divf %141, %142 : vector<8x128xf32>
    %144 = vector.extract_strided_slice %125 {offsets = [0, 256], sizes = [8, 128], strides = [1, 1]} : vector<8x384xf32> to vector<8x128xf32>
    %145 = vector.extract_strided_slice %127 {offsets = [0, 256], sizes = [8, 128], strides = [1, 1]} : vector<8x384xf32> to vector<8x128xf32>
    %146 = arith.addf %145, %13 : vector<8x128xf32>
    %147 = arith.mulf %135, %146 : vector<8x128xf32>
    %148 = arith.addf %144, %147 : vector<8x128xf32>
    %149 = math.tanh %148 : vector<8x128xf32>
    %cst_46 = arith.constant 1.000000e+00 : f32
    %150 = vector.broadcast %cst_46 : f32 to vector<8x128xf32>
    %151 = arith.subf %150, %143 : vector<8x128xf32>
    %152 = arith.mulf %151, %149 : vector<8x128xf32>
    %153 = arith.mulf %143, %118 : vector<8x128xf32>
    %154 = arith.addf %152, %153 : vector<8x128xf32>
    %c3_i32 = arith.constant 3 : i32
    %155 = arith.addi %15, %c3_i32 : i32
    %156 = vector.broadcast %155 : i32 to vector<8x128xi32>
    %157 = arith.cmpi slt, %156, %14 : vector<8x128xi32>
    %cst_47 = arith.constant 0.000000e+00 : f32
    %158 = vector.broadcast %cst_47 : f32 to vector<8x128xf32>
    %159 = arith.select %157, %154, %158 : vector<8x128xi1>, vector<8x128xf32>
    %c24_48 = arith.constant 24 : index
    %c0_49 = arith.constant 0 : index
    %160 = vector.load %arg15[%c24_48, %c0_49] : memref<64x128xf32, #tpu.memory_space<vmem>>, vector<8x128xf32>
    tpu.vector_store %arg15[%c24_48, %c0_49], %159 {strides = array<i32>} : memref<64x128xf32, #tpu.memory_space<vmem>>, vector<8x128xf32>,
    %c32 = arith.constant 32 : index
    %c0_50 = arith.constant 0 : index
    %161 = vector.load %arg14[%c32, %c0_50] : memref<64x384xf32, #tpu.memory_space<vmem>>, vector<8x384xf32>
    %162 = arith.truncf %154 : vector<8x128xf32> to vector<8x128xbf16>
    %cst_51 = arith.constant dense<0.000000e+00> : vector<8x384xf32>
    %163 = tpu.matmul %162, %10, %cst_51 {dimension_numbers = #tpu.dot_dimension_numbers<[1], [0], [0], [1], [0, 0, 1, 1], [], []>} : vector<8x128xbf16>, vector<128x384xbf16>, vector<8x384xf32> -> vector<8x384xf32>
    %164 = vector.extract_strided_slice %161 {offsets = [0, 0], sizes = [8, 128], strides = [1, 1]} : vector<8x384xf32> to vector<8x128xf32>
    %165 = vector.extract_strided_slice %163 {offsets = [0, 0], sizes = [8, 128], strides = [1, 1]} : vector<8x384xf32> to vector<8x128xf32>
    %166 = arith.addf %164, %165 : vector<8x128xf32>
    %167 = arith.negf %166 : vector<8x128xf32>
    %168 = math.exp %167 : vector<8x128xf32>
    %cst_52 = arith.constant 1.000000e+00 : f32
    %169 = vector.broadcast %cst_52 : f32 to vector<8x128xf32>
    %170 = arith.addf %169, %168 : vector<8x128xf32>
    %171 = arith.divf %169, %170 : vector<8x128xf32>
    %172 = vector.extract_strided_slice %161 {offsets = [0, 128], sizes = [8, 128], strides = [1, 1]} : vector<8x384xf32> to vector<8x128xf32>
    %173 = vector.extract_strided_slice %163 {offsets = [0, 128], sizes = [8, 128], strides = [1, 1]} : vector<8x384xf32> to vector<8x128xf32>
    %174 = arith.addf %172, %173 : vector<8x128xf32>
    %175 = arith.negf %174 : vector<8x128xf32>
    %176 = math.exp %175 : vector<8x128xf32>
    %cst_53 = arith.constant 1.000000e+00 : f32
    %177 = vector.broadcast %cst_53 : f32 to vector<8x128xf32>
    %178 = arith.addf %177, %176 : vector<8x128xf32>
    %179 = arith.divf %177, %178 : vector<8x128xf32>
    %180 = vector.extract_strided_slice %161 {offsets = [0, 256], sizes = [8, 128], strides = [1, 1]} : vector<8x384xf32> to vector<8x128xf32>
    %181 = vector.extract_strided_slice %163 {offsets = [0, 256], sizes = [8, 128], strides = [1, 1]} : vector<8x384xf32> to vector<8x128xf32>
    %182 = arith.addf %181, %13 : vector<8x128xf32>
    %183 = arith.mulf %171, %182 : vector<8x128xf32>
    %184 = arith.addf %180, %183 : vector<8x128xf32>
    %185 = math.tanh %184 : vector<8x128xf32>
    %cst_54 = arith.constant 1.000000e+00 : f32
    %186 = vector.broadcast %cst_54 : f32 to vector<8x128xf32>
    %187 = arith.subf %186, %179 : vector<8x128xf32>
    %188 = arith.mulf %187, %185 : vector<8x128xf32>
    %189 = arith.mulf %179, %154 : vector<8x128xf32>
    %190 = arith.addf %188, %189 : vector<8x128xf32>
    %c4_i32 = arith.constant 4 : i32
    %191 = arith.addi %15, %c4_i32 : i32
    %192 = vector.broadcast %191 : i32 to vector<8x128xi32>
    %193 = arith.cmpi slt, %192, %14 : vector<8x128xi32>
    %cst_55 = arith.constant 0.000000e+00 : f32
    %194 = vector.broadcast %cst_55 : f32 to vector<8x128xf32>
    %195 = arith.select %193, %190, %194 : vector<8x128xi1>, vector<8x128xf32>
    %c32_56 = arith.constant 32 : index
    %c0_57 = arith.constant 0 : index
    %196 = vector.load %arg15[%c32_56, %c0_57] : memref<64x128xf32, #tpu.memory_space<vmem>>, vector<8x128xf32>
    tpu.vector_store %arg15[%c32_56, %c0_57], %195 {strides = array<i32>} : memref<64x128xf32, #tpu.memory_space<vmem>>, vector<8x128xf32>,
    %c40 = arith.constant 40 : index
    %c0_58 = arith.constant 0 : index
    %197 = vector.load %arg14[%c40, %c0_58] : memref<64x384xf32, #tpu.memory_space<vmem>>, vector<8x384xf32>
    %198 = arith.truncf %190 : vector<8x128xf32> to vector<8x128xbf16>
    %cst_59 = arith.constant dense<0.000000e+00> : vector<8x384xf32>
    %199 = tpu.matmul %198, %10, %cst_59 {dimension_numbers = #tpu.dot_dimension_numbers<[1], [0], [0], [1], [0, 0, 1, 1], [], []>} : vector<8x128xbf16>, vector<128x384xbf16>, vector<8x384xf32> -> vector<8x384xf32>
    %200 = vector.extract_strided_slice %197 {offsets = [0, 0], sizes = [8, 128], strides = [1, 1]} : vector<8x384xf32> to vector<8x128xf32>
    %201 = vector.extract_strided_slice %199 {offsets = [0, 0], sizes = [8, 128], strides = [1, 1]} : vector<8x384xf32> to vector<8x128xf32>
    %202 = arith.addf %200, %201 : vector<8x128xf32>
    %203 = arith.negf %202 : vector<8x128xf32>
    %204 = math.exp %203 : vector<8x128xf32>
    %cst_60 = arith.constant 1.000000e+00 : f32
    %205 = vector.broadcast %cst_60 : f32 to vector<8x128xf32>
    %206 = arith.addf %205, %204 : vector<8x128xf32>
    %207 = arith.divf %205, %206 : vector<8x128xf32>
    %208 = vector.extract_strided_slice %197 {offsets = [0, 128], sizes = [8, 128], strides = [1, 1]} : vector<8x384xf32> to vector<8x128xf32>
    %209 = vector.extract_strided_slice %199 {offsets = [0, 128], sizes = [8, 128], strides = [1, 1]} : vector<8x384xf32> to vector<8x128xf32>
    %210 = arith.addf %208, %209 : vector<8x128xf32>
    %211 = arith.negf %210 : vector<8x128xf32>
    %212 = math.exp %211 : vector<8x128xf32>
    %cst_61 = arith.constant 1.000000e+00 : f32
    %213 = vector.broadcast %cst_61 : f32 to vector<8x128xf32>
    %214 = arith.addf %213, %212 : vector<8x128xf32>
    %215 = arith.divf %213, %214 : vector<8x128xf32>
    %216 = vector.extract_strided_slice %197 {offsets = [0, 256], sizes = [8, 128], strides = [1, 1]} : vector<8x384xf32> to vector<8x128xf32>
    %217 = vector.extract_strided_slice %199 {offsets = [0, 256], sizes = [8, 128], strides = [1, 1]} : vector<8x384xf32> to vector<8x128xf32>
    %218 = arith.addf %217, %13 : vector<8x128xf32>
    %219 = arith.mulf %207, %218 : vector<8x128xf32>
    %220 = arith.addf %216, %219 : vector<8x128xf32>
    %221 = math.tanh %220 : vector<8x128xf32>
    %cst_62 = arith.constant 1.000000e+00 : f32
    %222 = vector.broadcast %cst_62 : f32 to vector<8x128xf32>
    %223 = arith.subf %222, %215 : vector<8x128xf32>
    %224 = arith.mulf %223, %221 : vector<8x128xf32>
    %225 = arith.mulf %215, %190 : vector<8x128xf32>
    %226 = arith.addf %224, %225 : vector<8x128xf32>
    %c5_i32 = arith.constant 5 : i32
    %227 = arith.addi %15, %c5_i32 : i32
    %228 = vector.broadcast %227 : i32 to vector<8x128xi32>
    %229 = arith.cmpi slt, %228, %14 : vector<8x128xi32>
    %cst_63 = arith.constant 0.000000e+00 : f32
    %230 = vector.broadcast %cst_63 : f32 to vector<8x128xf32>
    %231 = arith.select %229, %226, %230 : vector<8x128xi1>, vector<8x128xf32>
    %c40_64 = arith.constant 40 : index
    %c0_65 = arith.constant 0 : index
    %232 = vector.load %arg15[%c40_64, %c0_65] : memref<64x128xf32, #tpu.memory_space<vmem>>, vector<8x128xf32>
    tpu.vector_store %arg15[%c40_64, %c0_65], %231 {strides = array<i32>} : memref<64x128xf32, #tpu.memory_space<vmem>>, vector<8x128xf32>,
    %c48 = arith.constant 48 : index
    %c0_66 = arith.constant 0 : index
    %233 = vector.load %arg14[%c48, %c0_66] : memref<64x384xf32, #tpu.memory_space<vmem>>, vector<8x384xf32>
    %234 = arith.truncf %226 : vector<8x128xf32> to vector<8x128xbf16>
    %cst_67 = arith.constant dense<0.000000e+00> : vector<8x384xf32>
    %235 = tpu.matmul %234, %10, %cst_67 {dimension_numbers = #tpu.dot_dimension_numbers<[1], [0], [0], [1], [0, 0, 1, 1], [], []>} : vector<8x128xbf16>, vector<128x384xbf16>, vector<8x384xf32> -> vector<8x384xf32>
    %236 = vector.extract_strided_slice %233 {offsets = [0, 0], sizes = [8, 128], strides = [1, 1]} : vector<8x384xf32> to vector<8x128xf32>
    %237 = vector.extract_strided_slice %235 {offsets = [0, 0], sizes = [8, 128], strides = [1, 1]} : vector<8x384xf32> to vector<8x128xf32>
    %238 = arith.addf %236, %237 : vector<8x128xf32>
    %239 = arith.negf %238 : vector<8x128xf32>
    %240 = math.exp %239 : vector<8x128xf32>
    %cst_68 = arith.constant 1.000000e+00 : f32
    %241 = vector.broadcast %cst_68 : f32 to vector<8x128xf32>
    %242 = arith.addf %241, %240 : vector<8x128xf32>
    %243 = arith.divf %241, %242 : vector<8x128xf32>
    %244 = vector.extract_strided_slice %233 {offsets = [0, 128], sizes = [8, 128], strides = [1, 1]} : vector<8x384xf32> to vector<8x128xf32>
    %245 = vector.extract_strided_slice %235 {offsets = [0, 128], sizes = [8, 128], strides = [1, 1]} : vector<8x384xf32> to vector<8x128xf32>
    %246 = arith.addf %244, %245 : vector<8x128xf32>
    %247 = arith.negf %246 : vector<8x128xf32>
    %248 = math.exp %247 : vector<8x128xf32>
    %cst_69 = arith.constant 1.000000e+00 : f32
    %249 = vector.broadcast %cst_69 : f32 to vector<8x128xf32>
    %250 = arith.addf %249, %248 : vector<8x128xf32>
    %251 = arith.divf %249, %250 : vector<8x128xf32>
    %252 = vector.extract_strided_slice %233 {offsets = [0, 256], sizes = [8, 128], strides = [1, 1]} : vector<8x384xf32> to vector<8x128xf32>
    %253 = vector.extract_strided_slice %235 {offsets = [0, 256], sizes = [8, 128], strides = [1, 1]} : vector<8x384xf32> to vector<8x128xf32>
    %254 = arith.addf %253, %13 : vector<8x128xf32>
    %255 = arith.mulf %243, %254 : vector<8x128xf32>
    %256 = arith.addf %252, %255 : vector<8x128xf32>
    %257 = math.tanh %256 : vector<8x128xf32>
    %cst_70 = arith.constant 1.000000e+00 : f32
    %258 = vector.broadcast %cst_70 : f32 to vector<8x128xf32>
    %259 = arith.subf %258, %251 : vector<8x128xf32>
    %260 = arith.mulf %259, %257 : vector<8x128xf32>
    %261 = arith.mulf %251, %226 : vector<8x128xf32>
    %262 = arith.addf %260, %261 : vector<8x128xf32>
    %c6_i32 = arith.constant 6 : i32
    %263 = arith.addi %15, %c6_i32 : i32
    %264 = vector.broadcast %263 : i32 to vector<8x128xi32>
    %265 = arith.cmpi slt, %264, %14 : vector<8x128xi32>
    %cst_71 = arith.constant 0.000000e+00 : f32
    %266 = vector.broadcast %cst_71 : f32 to vector<8x128xf32>
    %267 = arith.select %265, %262, %266 : vector<8x128xi1>, vector<8x128xf32>
    %c48_72 = arith.constant 48 : index
    %c0_73 = arith.constant 0 : index
    %268 = vector.load %arg15[%c48_72, %c0_73] : memref<64x128xf32, #tpu.memory_space<vmem>>, vector<8x128xf32>
    tpu.vector_store %arg15[%c48_72, %c0_73], %267 {strides = array<i32>} : memref<64x128xf32, #tpu.memory_space<vmem>>, vector<8x128xf32>,
    %c56 = arith.constant 56 : index
    %c0_74 = arith.constant 0 : index
    %269 = vector.load %arg14[%c56, %c0_74] : memref<64x384xf32, #tpu.memory_space<vmem>>, vector<8x384xf32>
    %270 = arith.truncf %262 : vector<8x128xf32> to vector<8x128xbf16>
    %cst_75 = arith.constant dense<0.000000e+00> : vector<8x384xf32>
    %271 = tpu.matmul %270, %10, %cst_75 {dimension_numbers = #tpu.dot_dimension_numbers<[1], [0], [0], [1], [0, 0, 1, 1], [], []>} : vector<8x128xbf16>, vector<128x384xbf16>, vector<8x384xf32> -> vector<8x384xf32>
    %272 = vector.extract_strided_slice %269 {offsets = [0, 0], sizes = [8, 128], strides = [1, 1]} : vector<8x384xf32> to vector<8x128xf32>
    %273 = vector.extract_strided_slice %271 {offsets = [0, 0], sizes = [8, 128], strides = [1, 1]} : vector<8x384xf32> to vector<8x128xf32>
    %274 = arith.addf %272, %273 : vector<8x128xf32>
    %275 = arith.negf %274 : vector<8x128xf32>
    %276 = math.exp %275 : vector<8x128xf32>
    %cst_76 = arith.constant 1.000000e+00 : f32
    %277 = vector.broadcast %cst_76 : f32 to vector<8x128xf32>
    %278 = arith.addf %277, %276 : vector<8x128xf32>
    %279 = arith.divf %277, %278 : vector<8x128xf32>
    %280 = vector.extract_strided_slice %269 {offsets = [0, 128], sizes = [8, 128], strides = [1, 1]} : vector<8x384xf32> to vector<8x128xf32>
    %281 = vector.extract_strided_slice %271 {offsets = [0, 128], sizes = [8, 128], strides = [1, 1]} : vector<8x384xf32> to vector<8x128xf32>
    %282 = arith.addf %280, %281 : vector<8x128xf32>
    %283 = arith.negf %282 : vector<8x128xf32>
    %284 = math.exp %283 : vector<8x128xf32>
    %cst_77 = arith.constant 1.000000e+00 : f32
    %285 = vector.broadcast %cst_77 : f32 to vector<8x128xf32>
    %286 = arith.addf %285, %284 : vector<8x128xf32>
    %287 = arith.divf %285, %286 : vector<8x128xf32>
    %288 = vector.extract_strided_slice %269 {offsets = [0, 256], sizes = [8, 128], strides = [1, 1]} : vector<8x384xf32> to vector<8x128xf32>
    %289 = vector.extract_strided_slice %271 {offsets = [0, 256], sizes = [8, 128], strides = [1, 1]} : vector<8x384xf32> to vector<8x128xf32>
    %290 = arith.addf %289, %13 : vector<8x128xf32>
    %291 = arith.mulf %279, %290 : vector<8x128xf32>
    %292 = arith.addf %288, %291 : vector<8x128xf32>
    %293 = math.tanh %292 : vector<8x128xf32>
    %cst_78 = arith.constant 1.000000e+00 : f32
    %294 = vector.broadcast %cst_78 : f32 to vector<8x128xf32>
    %295 = arith.subf %294, %287 : vector<8x128xf32>
    %296 = arith.mulf %295, %293 : vector<8x128xf32>
    %297 = arith.mulf %287, %262 : vector<8x128xf32>
    %298 = arith.addf %296, %297 : vector<8x128xf32>
    %c7_i32 = arith.constant 7 : i32
    %299 = arith.addi %15, %c7_i32 : i32
    %300 = vector.broadcast %299 : i32 to vector<8x128xi32>
    %301 = arith.cmpi slt, %300, %14 : vector<8x128xi32>
    %cst_79 = arith.constant 0.000000e+00 : f32
    %302 = vector.broadcast %cst_79 : f32 to vector<8x128xf32>
    %303 = arith.select %301, %298, %302 : vector<8x128xi1>, vector<8x128xf32>
    %c56_80 = arith.constant 56 : index
    %c0_81 = arith.constant 0 : index
    %304 = vector.load %arg15[%c56_80, %c0_81] : memref<64x128xf32, #tpu.memory_space<vmem>>, vector<8x128xf32>
    tpu.vector_store %arg15[%c56_80, %c0_81], %303 {strides = array<i32>} : memref<64x128xf32, #tpu.memory_space<vmem>>, vector<8x128xf32>,
    %c0_82 = arith.constant 0 : index
    %c0_83 = arith.constant 0 : index
    %305 = vector.load %arg13[%c0_82, %c0_83] : memref<8x128xf32, #tpu.memory_space<vmem>>, vector<8x128xf32>
    tpu.vector_store %arg13[%c0_82, %c0_83], %298 {strides = array<i32>} : memref<8x128xf32, #tpu.memory_space<vmem>>, vector<8x128xf32>,
    %c0_84 = arith.constant 0 : index
    %c0_85 = arith.constant 0 : index
    %306 = vector.load %arg15[%c0_84, %c0_85] : memref<64x128xf32, #tpu.memory_space<vmem>>, vector<64x128xf32>
    %307 = arith.truncf %306 : vector<64x128xf32> to vector<64x128xbf16>
    %c0_86 = arith.constant 0 : index
    %c0_87 = arith.constant 0 : index
    %308 = vector.load %arg10[%c0_86, %c0_87] : memref<128x128xbf16, #tpu.memory_space<vmem>>, vector<128x128xbf16>
    %cst_88 = arith.constant dense<0.000000e+00> : vector<64x128xf32>
    %309 = tpu.matmul %307, %308, %cst_88 {dimension_numbers = #tpu.dot_dimension_numbers<[1], [0], [0], [1], [0, 0, 1, 1], [], []>} : vector<64x128xbf16>, vector<128x128xbf16>, vector<64x128xf32> -> vector<64x128xf32>
    %c0_89 = arith.constant 0 : index
    %c0_90 = arith.constant 0 : index
    %310 = vector.load %arg11[%c0_89, %c0_90] : memref<1x128xf32, #tpu.memory_space<vmem>>, vector<1x128xf32>
    %311 = vector.broadcast %310 : vector<1x128xf32> to vector<64x128xf32>
    %312 = arith.addf %309, %311 : vector<64x128xf32>
    %cst_91 = arith.constant dense<0xFF800000> : vector<64xf32>
    %313 = vector.multi_reduction <maximumf>, %312, %cst_91 [1] : vector<64x128xf32> to vector<64xf32>
    %314 = vector.shape_cast %313 : vector<64xf32> to vector<64x1xf32>
    %315 = vector.broadcast %314 : vector<64x1xf32> to vector<64x128xf32>
    %316 = arith.subf %312, %315 : vector<64x128xf32>
    %317 = math.exp %316 : vector<64x128xf32>
    %cst_92 = arith.constant dense<0.000000e+00> : vector<64xf32>
    %318 = vector.multi_reduction <add>, %317, %cst_92 [1] : vector<64x128xf32> to vector<64xf32>
    %319 = vector.shape_cast %318 : vector<64xf32> to vector<64x1xf32>
    %320 = math.log %319 : vector<64x1xf32>
    %321 = vector.broadcast %314 : vector<64x1xf32> to vector<64x128xf32>
    %322 = arith.subf %312, %321 : vector<64x128xf32>
    %323 = vector.broadcast %320 : vector<64x1xf32> to vector<64x128xf32>
    %324 = arith.subf %322, %323 : vector<64x128xf32>
    %c0_93 = arith.constant 0 : index
    %c0_94 = arith.constant 0 : index
    %325 = vector.load %arg12[%c0_93, %c0_94] : memref<64x128xf32, #tpu.memory_space<vmem>>, vector<64x128xf32>
    tpu.vector_store %arg12[%c0_93, %c0_94], %324 {strides = array<i32>} : memref<64x128xf32, #tpu.memory_space<vmem>>, vector<64x128xf32>,
    return
  }
  func.func @transform_0(%arg0: i32) -> (i32, i32) {
    %c0_i32 = arith.constant 0 : i32
    %c0_i32_0 = arith.constant 0 : i32
    return %arg0, %c0_i32 : i32, i32
  }
  func.func @transform_1(%arg0: i32) -> (i32, i32) {
    %c0_i32 = arith.constant 0 : i32
    %c0_i32_0 = arith.constant 0 : i32
    %c0_i32_1 = arith.constant 0 : i32
    return %c0_i32, %c0_i32_0 : i32, i32
  }
  func.func @transform_2(%arg0: i32) -> (i32, i32) {
    %c0_i32 = arith.constant 0 : i32
    %c0_i32_0 = arith.constant 0 : i32
    %c0_i32_1 = arith.constant 0 : i32
    return %c0_i32, %c0_i32_0 : i32, i32
  }
  func.func @transform_3(%arg0: i32) -> (i32, i32) {
    %c0_i32 = arith.constant 0 : i32
    %c0_i32_0 = arith.constant 0 : i32
    %c0_i32_1 = arith.constant 0 : i32
    return %c0_i32, %c0_i32_0 : i32, i32
  }
  func.func @transform_4(%arg0: i32) -> (i32, i32) {
    %c0_i32 = arith.constant 0 : i32
    %c0_i32_0 = arith.constant 0 : i32
    %c0_i32_1 = arith.constant 0 : i32
    return %c0_i32, %c0_i32_0 : i32, i32
  }
  func.func @transform_5(%arg0: i32) -> (i32, i32) {
    %c0_i32 = arith.constant 0 : i32
    %c0_i32_0 = arith.constant 0 : i32
    %c0_i32_1 = arith.constant 0 : i32
    return %c0_i32, %c0_i32_0 : i32, i32
  }
  func.func @transform_6(%arg0: i32) -> (i32, i32) {
    %c0_i32 = arith.constant 0 : i32
    %c0_i32_0 = arith.constant 0 : i32
    %c0_i32_1 = arith.constant 0 : i32
    return %c0_i32, %c0_i32_0 : i32, i32
  }
  func.func @transform_7(%arg0: i32) -> (i32, i32) {
    %c0_i32 = arith.constant 0 : i32
    %c0_i32_0 = arith.constant 0 : i32
    %c0_i32_1 = arith.constant 0 : i32
    return %c0_i32, %c0_i32_0 : i32, i32
  }
  func.func @transform_8(%arg0: i32) -> (i32, i32) {
    %c0_i32 = arith.constant 0 : i32
    %c0_i32_0 = arith.constant 0 : i32
    %c0_i32_1 = arith.constant 0 : i32
    return %c0_i32, %c0_i32_0 : i32, i32
  }
  func.func @transform_9(%arg0: i32) -> (i32, i32) {
    %c0_i32 = arith.constant 0 : i32
    %c0_i32_0 = arith.constant 0 : i32
    %c0_i32_1 = arith.constant 0 : i32
    return %c0_i32, %c0_i32_0 : i32, i32
  }
  func.func @transform_10(%arg0: i32) -> (i32, i32) {
    %c0_i32 = arith.constant 0 : i32
    %c0_i32_0 = arith.constant 0 : i32
    %c0_i32_1 = arith.constant 0 : i32
    return %c0_i32, %c0_i32_0 : i32, i32
  }
  func.func @transform_11(%arg0: i32) -> (i32, i32) {
    %c0_i32 = arith.constant 0 : i32
    %c0_i32_0 = arith.constant 0 : i32
    return %arg0, %c0_i32 : i32, i32
  }
}

</mosaic_0001>

<bundles_post_ra>
// kernel: tpu_custom_call.1
= control target key start
LH: loop header
LB: loop body
LE: loop exit
PB: predicated region body
PF: predicated region fallthrough
CT: control target
= control target key end

     0   :  { %16 = vsyncpa [#allocation6], 0  ;;  %s3356_s0 = inlined_call_operand.hbm [shape: bf16[64,128], index: 0, kind: input, shape index: {}]   ;;  %s3357_s1 = inlined_call_operand.hbm [shape: s32[8,128], index: 1, kind: input, shape index: {}]   ;;  %s3358_s2 = inlined_call_operand.hbm [shape: f32[8,32], index: 2, kind: input, shape index: {}]   ;;  %s3359_s3 = inlined_call_operand.hbm [shape: f32[32,128], index: 3, kind: input, shape index: {}]   ;;  %s3360_s4 = inlined_call_operand.vmem [shape: f32[1,128], index: 4, kind: input, shape index: {}]   ;;  %s3361_s5 = inlined_call_operand.hbm [shape: bf16[128,384], index: 5, kind: input, shape index: {}]   ;;  %s3362_s6 = inlined_call_operand.vmem [shape: f32[1,384], index: 6, kind: input, shape index: {}]   ;;  %s3363_s7 = inlined_call_operand.hbm [shape: bf16[128,384], index: 7, kind: input, shape index: {}]   ;;  %s3364_s8 = inlined_call_operand.vmem [shape: f32[1,128], index: 8, kind: input, shape index: {}]   ;;  %s3365_s9 = inlined_call_operand.hbm [shape: bf16[128,128], index: 9, kind: input, shape index: {}]   ;;  %s3366_s10 = inlined_call_operand.vmem [shape: f32[1,128], index: 10, kind: input, shape index: {}]   ;;  %s3367_s11 = inlined_call_operand.hbm [shape: f32[64,128], index: 11, kind: output, shape index: {}]  }
   0x1   :  { %17 = vsyncpa [#allocation9], 0 }
   0x2   :  { %18 = vsyncpa [#allocation12], 0 }
   0x3   :  { %19 = vsyncpa [#allocation15], 0 }
   0x4   :  { %20 = vsyncpa [#allocation7], 0  ;;  %s2731_s17 = smov [#allocation8]   ;;  %s2732_s19 = smov [#allocation11]  }
   0x5   :  { %s39_s18 = sshll.u32 %s2731_s17, 4  ;;  %s58_s20 = sshll.u32 %s2732_s19, 4  ;;  %s40_s18 = int_to_ptr.vmem [resolvable:$true] %s39_s18  ;;  %s59_s20 = int_to_ptr.vmem [resolvable:$true] %s58_s20 }
   0x6   :  { %s2569_s21 = scalar_lea.vmem %s40_s18, 128  ;;  %p2574_p1 = scmp.lt.s32.totalorder %s40_s18, %s40_s18 }
   0x7   :  { %p2570_p0 = scmp.ne.s32.totalorder %s40_s18, %s2569_s21  ;;  %p2575_p2 = scmp.lt.s32.totalorder %s2569_s21, %s2569_s21 }
   0x9   :  { %p2576_p3 = por %p2575_p2, %p2574_p1 }
   0xb   :  { %p2577_p4 = pnand %p2576_p3, %p2570_p0 }
   0xd   :  { %2580 = shalt.err (!%p2577_p4)
}
   0xe   :  { %42 = dma.hbm_to_vmem [thread:$0]  %s3357_s1, 128, %s40_s18, [#allocation9]  }
   0xf   :  { %s2589_s24 = scalar_lea.vmem %s59_s20, 512  ;;  %p2594_p6 = scmp.lt.s32.totalorder %s59_s20, %s59_s20 }
  0x10   :  { %p2590_p5 = scmp.ne.s32.totalorder %s59_s20, %s2589_s24  ;;  %p2595_p7 = scmp.lt.s32.totalorder %s2589_s24, %s2589_s24 }
  0x12   :  { %p2596_p8 = por %p2595_p7, %p2594_p6 }
  0x14   :  { %p2597_p9 = pnand %p2596_p8, %p2590_p5 }
  0x16   :  { %2600 = shalt.err (!%p2597_p9)
}
  0x17   :  { %s2733_s25 = smov 128   ;;  %s2734_s26 = smov 8  }
  0x18   :  { %64 = dma.hbm_to_vmem [thread:$0]  %s3359_s3, 512, %s59_s20, [#allocation12], %s2733_s25, %s2733_s25, %s2734_s26  }
  0x19   :  { %s2735_s29 = smov [#allocation14]   ;;  %s2736_s12 = smov [#allocation5]  }
  0x1a   :  { %s86_s30 = sshll.u32 %s2735_s29, 4  ;;  %s26_s1 = sshll.u32 %s2736_s12, 4  ;;  %s87_s30 = int_to_ptr.vmem [resolvable:$true] %s86_s30  ;;  %s27_s1 = int_to_ptr.vmem [resolvable:$true] %s26_s1 }
  0x1b   :  { %s2609_s13 = scalar_lea.vmem %s87_s30, 3072  ;;  %p2614_p11 = scmp.lt.s32.totalorder %s87_s30, %s87_s30 }
  0x1c   :  { %p2610_p10 = scmp.ne.s32.totalorder %s87_s30, %s2609_s13  ;;  %p2615_p12 = scmp.lt.s32.totalorder %s2609_s13, %s2609_s13 }
  0x1e   :  { %p2616_p13 = por %p2615_p12, %p2614_p11 }
  0x20   :  { %p2617_p0 = pnand %p2616_p13, %p2610_p10 }
  0x22   :  { %2620 = shalt.err (!%p2617_p0)
}
  0x23   :  { %s2737_s14 = smov 192   ;;  %s2738_s15 = smov 12  }
  0x24   :  { %92 = dma.hbm_to_vmem [thread:$0]  %s3363_s7, 3072, %s87_s30, [#allocation15], %s2737_s14, %s2737_s14, %s2738_s15  }
  0x25   :  { %s2629_s17 = scalar_lea.vmem %s27_s1, 512  ;;  %p2634_p2 = scmp.lt.s32.totalorder %s27_s1, %s27_s1 }
  0x26   :  { %p2630_p1 = scmp.ne.s32.totalorder %s27_s1, %s2629_s17  ;;  %p2635_p3 = scmp.lt.s32.totalorder %s2629_s17, %s2629_s17 }
  0x28   :  { %p2636_p4 = por %p2635_p3, %p2634_p2 }
  0x2a   :  { %p2637_p5 = pnand %p2636_p4, %p2630_p1 }
  0x2c   :  { %2640 = shalt.err (!%p2637_p5)
}
  0x2d   :  { %s2739_s18 = smov 64   ;;  %s2740_s19 = smov 4  }
  0x2e   :  { %32 = dma.hbm_to_vmem [thread:$0]  %s3356_s0, 512, %s27_s1, [#allocation6], %s2739_s18, %s2739_s18, %s2740_s19  }
  0x2f   :  { %s2741_s22 = smov [#allocation10]   ;;  %s2742_s24 = smov [#allocation13]  }
  0x30   :  { %s49_s23 = sshll.u32 %s2741_s22, 4  ;;  %s72_s7 = sshll.u32 %s2742_s24, 4  ;;  %s50_s23 = int_to_ptr.vmem [resolvable:$true] %s49_s23  ;;  %s73_s7 = int_to_ptr.vmem [resolvable:$true] %s72_s7 }
  0x31   :  { %s2649_s27 = scalar_lea.vmem %s50_s23, 128  ;;  %p2654_p7 = scmp.lt.s32.totalorder %s50_s23, %s50_s23 }
  0x32   :  { %p2650_p6 = scmp.ne.s32.totalorder %s50_s23, %s2649_s27  ;;  %p2655_p8 = scmp.lt.s32.totalorder %s2649_s27, %s2649_s27 }
  0x34   :  { %p2656_p9 = por %p2655_p8, %p2654_p7 }
  0x36   :  { %p2657_p10 = pnand %p2656_p9, %p2650_p6 }
  0x38   :  { %2660 = shalt.err (!%p2657_p10)
}
  0x39   :  { %52 = dma.hbm_to_vmem [thread:$0]  %s3358_s2, 128, %s50_s23, [#allocation9]  }
  0x3a   :  { %s2669_s30 = scalar_lea.vmem %s73_s7, 3072  ;;  %p2674_p12 = scmp.lt.s32.totalorder %s73_s7, %s73_s7 }
  0x3b   :  { %p2670_p11 = scmp.ne.s32.totalorder %s73_s7, %s2669_s30  ;;  %p2675_p13 = scmp.lt.s32.totalorder %s2669_s30, %s2669_s30 }
  0x3d   :  { %p2676_p0 = por %p2675_p13, %p2674_p12 }
  0x3f   :  { %p2677_p1 = pnand %p2676_p0, %p2670_p11 }
  0x41   :  { %2680 = shalt.err (!%p2677_p1)
}
  0x42   :  { %78 = dma.hbm_to_vmem [thread:$0]  %s3361_s5, 3072, %s73_s7, [#allocation12], %s2737_s14, %s2737_s14, %s2738_s15  }
  0x43   :  { %s2743_s1 = smov [#allocation16]  }
  0x44   :  { %s100_s13 = sshll.u32 %s2743_s1, 4  ;;  %s101_s13 = int_to_ptr.vmem [resolvable:$true] %s100_s13 }
  0x45   :  { %s2689_s16 = scalar_lea.vmem %s101_s13, 1024  ;;  %p2694_p3 = scmp.lt.s32.totalorder %s101_s13, %s101_s13 }
  0x46   :  { %p2690_p2 = scmp.ne.s32.totalorder %s101_s13, %s2689_s16  ;;  %p2695_p4 = scmp.lt.s32.totalorder %s2689_s16, %s2689_s16 }
  0x48   :  { %p2696_p5 = por %p2695_p4, %p2694_p3 }
  0x4a   :  { %p2697_p6 = pnand %p2696_p5, %p2690_p2 }
  0x4c   :  { %2700 = shalt.err (!%p2697_p6)
}
  0x4d   :  { %106 = dma.hbm_to_vmem [thread:$0]  %s3365_s9, 1024, %s101_s13, [#allocation15], %s2739_s18, %s2739_s18, %s2740_s19  }
  0x4e   :  { %2721 = dma.done.wait [#allocation6], 512  }
  0x4f   :  { %2722 = vsyncadd [#allocation6], 4294966784 }
  0x50   :  { %2723 = dma.done.wait [#allocation9], 256  }
  0x51   :  { %2724 = vsyncadd [#allocation9], 4294967040 }
  0x52   :  { %2725 = dma.done.wait [#allocation12], 3584  }
  0x53   :  { %2726 = vsyncadd [#allocation12], 4294963712 }
  0x54   :  { %2727 = dma.done.wait [#allocation15], 4096  }
  0x55   :  { %2728 = vsyncadd [#allocation15], 4294963200  ;;  %v3370_v0 = vmov 0.0   ;;  %vm2745_vm0 = vmmov 0   ;;  %v3368_v1 = vmov 0   ;;  %v139_v2 = vld [vmem:[#allocation11 + $0x18] sm:$0xff] }
  0x56   :  { %2116 = vmatprep.subr.mxu0 %v3370_v0  ;;  %2124 = vmatprep.mubr.msk.f32.mxu0 %vm2745_vm0, %v3370_v0  ;;  %v138_v3 = vld [vmem:[#allocation11 + $0x10] sm:$0xff]  ;;  %v137_v4 = vld [vmem:[#allocation11 + $0x8] sm:$0xff]  ;;  %v136_v5 = vld [vmem:[#allocation11] sm:$0xff]  ;;  %vm147_vm1 = vcmask 261120  }
  0x57   :  { %463 = vmatprep.mubr.bf16.mxu1 %v3368_v1  ;;  %2117 = vmatpush3.msra.mxu0 %v139_v2  ;;  %v2352_v6 = vld [vmem:[#allocation13 + $0xac] ss:$12 sps:$4 sm:$0xff]   ;;  %v2354_v7 = vld [vmem:[#allocation13 + $0xa8] ss:$12 sps:$4 sm:$0xff]   ;;  %v2357_v10 = vld [vmem:[#allocation13 + $0x90] ss:$12 sps:$4 sm:$0xff]   ;;  %v264_v2 = vlaneseq }
  0x58   :  { %2118 = vmatprep.subr.mxu0 %v3370_v0  ;;  %v135_v8 = vld [vmem:[#allocation10] sm:$0xff]  ;;  %v2355_v9 = vld [vmem:[#allocation13 + $0x94] ss:$12 sps:$4 sm:$0xff]   ;;  %431 = vmatprep.subr.bf16.mxu1 %v2352_v6  ;;  %v2363_v15 = vld [vmem:[#allocation13 + $0x64] ss:$12 sps:$4 sm:$0xff]  }
  0x59   :  { %2119 = vmatpush3.msra.mxu0 %v138_v3  ;;  %432 = vmatpush1.bf16.msra.mxu1 %v2354_v7  ;;  %v2358_v11 = vld [vmem:[#allocation13 + $0xb0] ss:$12 sps:$4 sm:$0xff]   ;;  %v2362_v13 = vld [vmem:[#allocation13 + $0x98] ss:$12 sps:$4 sm:$0xff]   ;;  %v2366_v16 = vld [vmem:[#allocation13 + $0x80] ss:$12 sps:$4 sm:$0xff]  }
  0x5a   :  { %2120 = vmatprep.subr.mxu0 %v3370_v0  ;;  %433 = vmatprep.subr.bf16.mxu1 %v2355_v9  ;;  %v2359_v12 = vld [vmem:[#allocation13 + $0x7c] ss:$12 sps:$4 sm:$0xff]   ;;  %v2361_v14 = vld [vmem:[#allocation13 + $0x78] ss:$12 sps:$4 sm:$0xff]   ;;  %v2365_v17 = vld [vmem:[#allocation13 + $0x60] ss:$12 sps:$4 sm:$0xff]  }
  0x5b   :  { %2121 = vmatpush3.msra.mxu0 %v137_v4  ;;  %v2367_v18 = vld [vmem:[#allocation13 + $0x4c] ss:$12 sps:$4 sm:$0xff]   ;;  %v2370_v19 = vld [vmem:[#allocation13 + $0x68] ss:$12 sps:$4 sm:$0xff]   ;;  %v2374_v22 = vld [vmem:[#allocation13 + $0x50] ss:$12 sps:$4 sm:$0xff]  }
  0x5c   :  { %2122 = vmatprep.subr.mxu0 %v3370_v0  ;;  %v2369_v20 = vld [vmem:[#allocation13 + $0x48] ss:$12 sps:$4 sm:$0xff]   ;;  %v2373_v23 = vld [vmem:[#allocation13 + $0x30] ss:$12 sps:$4 sm:$0xff]   ;;  %v2378_v26 = vld [vmem:[#allocation13 + $0x38] ss:$12 sps:$4 sm:$0xff]  }
  0x5d   :  { %2123 = vmatpush3.msra.mxu0 %v136_v5  ;;  %434 = vmatpush1.bf16.msra.mxu1 %v2357_v10  ;;  %v2371_v21 = vld [vmem:[#allocation13 + $0x34] ss:$12 sps:$4 sm:$0xff]   ;;  %v2375_v25 = vld [vmem:[#allocation13 + $0x1c] ss:$12 sps:$4 sm:$0xff]   ;;  %v2377_v27 = vld [vmem:[#allocation13 + $0x18] ss:$12 sps:$4 sm:$0xff]  }
  0x5e   :  { %2125 = vmatmul.mubr.msk.f32.vlgmr.msra.gmra.mxu0 %vm147_vm1, %v135_v8  ;;  %2127 = vmatprep.subr.bf16.mxu0 %v2358_v11  ;;  %v2383_v24 = vld [vmem:[#allocation5] sm:$0xff]   ;;  %v2382_v29 = vld [vmem:[#allocation13 + $0x20] ss:$12 sps:$4 sm:$0xff]   ;;  %v2388_v34 = vld [vmem:[#allocation5 + $0x8] sm:$0xff]   ;;  %v265_v3 = vshrl.u32 %v264_v2, 7 }
  0x5f   :  { %2128 = vmatpush3.bf16.msra.mxu0 %v2358_v11  ;;  %435 = vmatprep.subr.bf16.mxu1 %v2359_v12  ;;  %v2379_v28 = vld [vmem:[#allocation13 + $0x4] ss:$12 sps:$4 sm:$0xff]   ;;  %v2381_v30 = vld [vmem:[#allocation13] ss:$12 sps:$4 sm:$0xff]   ;;  %v2384_v31 = vld [vmem:[#allocation13 + $0x8] ss:$12 sps:$4 sm:$0xff]  }
  0x60   :  { %2129 = vmatprep.subr.bf16.mxu0 %v2362_v13  ;;  %2143 = vmatprep.mubr.bf16.mxu0 %v2383_v24  ;;  %v2851_v32 = vld [vmem:[#allocation14 + $0xac] ss:$12 sps:$4 sm:$0xff]   ;;  %v2853_v33 = vld [vmem:[#allocation14 + $0xa8] ss:$12 sps:$4 sm:$0xff]   ;;  %v2858_v36 = vld [vmem:[#allocation14 + $0xb0] ss:$12 sps:$4 sm:$0xff]  }
  0x61   :  { %436 = vmatpush1.bf16.msra.mxu1 %v2361_v14  ;;  %v2856_v35 = vld [vmem:[#allocation14 + $0x94] ss:$12 sps:$4 sm:$0xff]   ;;  %v2861_v37 = vld [vmem:[#allocation14 + $0x90] ss:$12 sps:$4 sm:$0xff]   ;;  %v2868_v39 = vld [vmem:[#allocation14 + $0x98] ss:$12 sps:$4 sm:$0xff]  }
  0x62   :  { %437 = vmatprep.subr.bf16.mxu1 %v2363_v15  ;;  %v2865_v38 = vld [vmem:[#allocation14 + $0x7c] ss:$12 sps:$4 sm:$0xff]   ;;  %v2870_v40 = vld [vmem:[#allocation14 + $0x78] ss:$12 sps:$4 sm:$0xff]   ;;  %v2878_v43 = vld [vmem:[#allocation14 + $0x80] ss:$12 sps:$4 sm:$0xff]  }
  0x63   :  { %2130 = vmatpush3.bf16.msra.mxu0 %v2362_v13  ;;  %v2398_v41 = vld [vmem:[#allocation5 + $0x10] sm:$0xff]   ;;  %v2882_v45 = vld [vmem:[#allocation14 + $0x4c] ss:$12 sps:$4 sm:$0xff]   ;;  %v2891_v47 = vld [vmem:[#allocation14 + $0x68] ss:$12 sps:$4 sm:$0xff]   ;;  %v266_v4 = vsub.s32 0, %v265_v3 }
  0x64   :  { %2131 = vmatprep.subr.bf16.mxu0 %v2366_v16  ;;  %v2874_v42 = vld [vmem:[#allocation14 + $0x64] ss:$12 sps:$4 sm:$0xff]   ;;  %v2880_v44 = vld [vmem:[#allocation14 + $0x60] ss:$12 sps:$4 sm:$0xff]   ;;  %v2893_v48 = vld [vmem:[#allocation14 + $0x48] ss:$12 sps:$4 sm:$0xff]  }
  0x65   :  { %438 = vmatpush1.bf16.msra.mxu1 %v2365_v17  ;;  %v2407_v46 = vld [vmem:[#allocation5 + $0x18] sm:$0xff]   ;;  %v2897_v49 = vld [vmem:[#allocation14 + $0x34] ss:$12 sps:$4 sm:$0xff]   ;;  %v2903_v50 = vld [vmem:[#allocation14 + $0x50] ss:$12 sps:$4 sm:$0xff]   ;;  %v274_v5 = vsub.s32 2, %v265_v3 }
  0x66   :  { %439 = vmatprep.subr.bf16.mxu1 %v2367_v18  ;;  %v2905_v51 = vld [vmem:[#allocation14 + $0x30] ss:$12 sps:$4 sm:$0xff]   ;;  %v2914_v53 = vld [vmem:[#allocation14 + $0x38] ss:$12 sps:$4 sm:$0xff]   ;;  %v2922_v55 = vld [vmem:[#allocation14 + $0x20] ss:$12 sps:$4 sm:$0xff]  }
  0x67   :  { %2132 = vmatpush3.bf16.msra.mxu0 %v2366_v16  ;;  %v2909_v52 = vld [vmem:[#allocation14 + $0x1c] ss:$12 sps:$4 sm:$0xff]   ;;  %v2916_v54 = vld [vmem:[#allocation14 + $0x18] ss:$12 sps:$4 sm:$0xff]   ;;  %v2930_v57 = vld [vmem:[#allocation14] ss:$12 sps:$4 sm:$0xff]  }
  0x68   :  { %2133 = vmatprep.subr.bf16.mxu0 %v2370_v19  ;;  %v2928_v56 = vld [vmem:[#allocation14 + $0x4] ss:$12 sps:$4 sm:$0xff]   ;;  %v2932_v58 = vld [vmem:[#allocation14 + $0x8] ss:$12 sps:$4 sm:$0xff]   ;;  %v270_v7 = vsub.s32 1, %v265_v3 }
  0x69   :  { %440 = vmatpush1.bf16.msra.mxu1 %v2369_v20  ;;  %v1915_v59 = vld [vmem:[%s3360_s4] ss:$0 sm:$0xff] }
  0x6a   :  { %441 = vmatprep.subr.bf16.mxu1 %v2371_v21  ;;  %v262_v6 = vld [vmem:[%s3362_s6] sm:$0x7] }
  0x6b   :  { %2134 = vmatpush3.bf16.msra.mxu0 %v2370_v19  ;;  %v267_v9 = vrot.slane %v262_v6, %v266_v4  ;;  %v2976_v10 = vrot.slane %v262_v6, %v274_v5  ;;  %v2980_v12 = vrot.slane %v262_v6, %v270_v7 }
  0x6c   :  { %2135 = vmatprep.subr.bf16.mxu0 %v2374_v22 }
  0x6d   :  { %442 = vmatpush1.bf16.msra.mxu1 %v2373_v23 }
  0x6e   :  { %443 = vmatprep.subr.bf16.mxu1 %v2375_v25 }
  0x6f   :  { %2136 = vmatpush3.bf16.msra.mxu0 %v2374_v22 }
  0x70   :  { %2137 = vmatprep.subr.bf16.mxu0 %v2378_v26 }
  0x71   :  { %444 = vmatpush1.bf16.msra.mxu1 %v2377_v27 }
  0x72   :  { %445 = vmatprep.subr.bf16.mxu1 %v2379_v28 }
  0x73   :  { %2138 = vmatpush3.bf16.msra.mxu0 %v2378_v26 }
  0x74   :  { %2139 = vmatprep.subr.bf16.mxu0 %v2382_v29 }
  0x75   :  { %446 = vmatpush1.bf16.msra.mxu1 %v2381_v30 }
  0x76   :  { %767 = vmatprep.subr.bf16.mxu1 %v2851_v32 }
  0x77   :  { %2140 = vmatpush3.bf16.msra.mxu0 %v2382_v29 }
  0x78   :  { %2141 = vmatprep.subr.bf16.mxu0 %v2384_v31  ;;  %464 = vmatmul.mubr.bf16.vlgmr.msra.gmra.mxu1 %v2383_v24 }
  0x79   :  { %768 = vmatpush1.bf16.msra.mxu1 %v2853_v33  ;;  %473 = vmatprep.mubr.bf16.mxu1 %v3368_v1 }
  0x7a   :  { %769 = vmatprep.subr.bf16.mxu1 %v2856_v35 }
  0x7b   :  { %2142 = vmatpush3.bf16.msra.mxu0 %v2384_v31 }
  0x7c   :  { %2151 = vmatprep.subr.bf16.mxu0 %v3370_v0 }
  0x7d   :  { %770 = vmatpush1.bf16.msra.mxu1 %v2861_v37 }
  0x7e   :  { %2144 = vmatmul.mubr.bf16.vlgmr.msra.gmra.mxu0 %v2388_v34  ;;  %771 = vmatprep.subr.bf16.mxu1 %v2865_v38 }
  0x7f   :  { %2152 = vmatpush3.bf16.msra.mxu0 %v2858_v36  ;;  %2147 = vmatprep.mubr.bf16.mxu0 %v2398_v41 }
  0x80   :  { %2153 = vmatprep.subr.bf16.mxu0 %v3370_v0  ;;  %474 = vmatmul.mubr.bf16.gmra.mxu1 %v2388_v34 }
  0x81   :  { %772 = vmatpush1.bf16.msra.mxu1 %v2870_v40  ;;  %483 = vmatprep.mubr.bf16.mxu1 %v3368_v1 }
  0x82   :  { %773 = vmatprep.subr.bf16.mxu1 %v2874_v42 }
  0x83   :  { %2154 = vmatpush3.bf16.msra.mxu0 %v2868_v39 }
  0x84   :  { %2155 = vmatprep.subr.bf16.mxu0 %v3370_v0 }
  0x85   :  { %774 = vmatpush1.bf16.msra.mxu1 %v2880_v44 }
  0x86   :  { %2148 = vmatmul.mubr.bf16.gmra.mxu0 %v2407_v46  ;;  %775 = vmatprep.subr.bf16.mxu1 %v2882_v45 }
  0x87   :  { %2156 = vmatpush3.bf16.msra.mxu0 %v2878_v43  ;;  %2167 = vmatprep.mubr.msk.bf16.mxu0 %vm2745_vm0, %v3370_v0 }
  0x88   :  { %2157 = vmatprep.subr.bf16.mxu0 %v3370_v0  ;;  %484 = vmatmul.mubr.bf16.gmra.mxu1 %v2398_v41 }
  0x89   :  { %776 = vmatpush1.bf16.msra.mxu1 %v2893_v48  ;;  %493 = vmatprep.mubr.bf16.mxu1 %v3368_v1 }
  0x8a   :  { %777 = vmatprep.subr.bf16.mxu1 %v2897_v49 }
  0x8b   :  { %2158 = vmatpush3.bf16.msra.mxu0 %v2891_v47 }
  0x8c   :  { %2159 = vmatprep.subr.bf16.mxu0 %v3370_v0 }
  0x8d   :  { %778 = vmatpush1.bf16.msra.mxu1 %v2905_v51 }
  0x8e   :  { %779 = vmatprep.subr.bf16.mxu1 %v2909_v52 }
  0x8f   :  { %2160 = vmatpush3.bf16.msra.mxu0 %v2903_v50 }
  0x90   :  { %2161 = vmatprep.subr.bf16.mxu0 %v3370_v0  ;;  %494 = vmatmul.mubr.bf16.gmra.mxu1 %v2407_v46 }
  0x91   :  { %780 = vmatpush1.bf16.msra.mxu1 %v2916_v54  ;;  %799 = vmatprep.mubr.bf16.mxu1 %v3368_v1 }
  0x92   :  { %781 = vmatprep.subr.bf16.mxu1 %v2928_v56 }
  0x93   :  { %2162 = vmatpush3.bf16.msra.mxu0 %v2914_v53 }
  0x94   :  { %2163 = vmatprep.subr.bf16.mxu0 %v3370_v0 }
  0x95   :  { %782 = vmatpush1.bf16.msra.mxu1 %v2930_v57 }
  0x96   :  { %878 = vmatprep.subr.bf16.mxu1 %v2851_v32 }
  0x97   :  { %2164 = vmatpush3.bf16.msra.mxu0 %v2922_v55 }
  0x98   :  { %2165 = vmatprep.subr.bf16.mxu0 %v3370_v0 }
  0x9b   :  { %2166 = vmatpush3.bf16.msra.mxu0 %v2932_v58 }
  0x9c   :  { %2171 = vmatprep.subr.bf16.mxu0 %v3370_v0 }
 0x11e   :  { %v217_v60 = vpop.f32.mrf.mxu0 }
 0x11f   :  { %v2942_v61 = vadd.f32 %v1915_v59, %v217_v60 }
 0x120   :  { %v2126_v62 = vpop.f32.mrf.mxu0 }
 0x121   :  { %v638_v63 = vpack.c.bf16 %v2942_v61, %v2942_v61 }
 0x123   :  { %800 = vmatmul.mubr.bf16.vlgmr.msra.gmra.mxu1 %v638_v63  ;;  %2168 = vmatmul.mubr.bf16.vlgmr.msra.gmra.mxu0 %v638_v63 }
 0x124   :  { %879 = vmatpush1.bf16.msra.mxu1 %v2853_v33  ;;  %2172 = vmatpush3.bf16.msra.mxu0 %v2858_v36 }
 0x125   :  { %880 = vmatprep.subr.bf16.mxu1 %v2856_v35  ;;  %2173 = vmatprep.subr.bf16.mxu0 %v3370_v0 }
 0x126   :  { %910 = vmatprep.mubr.bf16.mxu1 %v3368_v1  ;;  %2187 = vmatprep.mubr.msk.bf16.mxu0 %vm2745_vm0, %v3370_v0 }
 0x128   :  { %881 = vmatpush1.bf16.msra.mxu1 %v2861_v37  ;;  %2174 = vmatpush3.bf16.msra.mxu0 %v2868_v39 }
 0x129   :  { %882 = vmatprep.subr.bf16.mxu1 %v2865_v38  ;;  %2175 = vmatprep.subr.bf16.mxu0 %v3370_v0 }
 0x12c   :  { %883 = vmatpush1.bf16.msra.mxu1 %v2870_v40  ;;  %2176 = vmatpush3.bf16.msra.mxu0 %v2878_v43 }
 0x12d   :  { %884 = vmatprep.subr.bf16.mxu1 %v2874_v42  ;;  %2177 = vmatprep.subr.bf16.mxu0 %v3370_v0 }
 0x130   :  { %885 = vmatpush1.bf16.msra.mxu1 %v2880_v44  ;;  %2178 = vmatpush3.bf16.msra.mxu0 %v2891_v47 }
 0x131   :  { %886 = vmatprep.subr.bf16.mxu1 %v2882_v45  ;;  %2179 = vmatprep.subr.bf16.mxu0 %v3370_v0 }
 0x134   :  { %887 = vmatpush1.bf16.msra.mxu1 %v2893_v48  ;;  %2180 = vmatpush3.bf16.msra.mxu0 %v2903_v50 }
 0x135   :  { %888 = vmatprep.subr.bf16.mxu1 %v2897_v49  ;;  %2181 = vmatprep.subr.bf16.mxu0 %v3370_v0 }
 0x138   :  { %889 = vmatpush1.bf16.msra.mxu1 %v2905_v51  ;;  %2182 = vmatpush3.bf16.msra.mxu0 %v2914_v53  ;;  %v465_v8 = vpop.f32.mrf.mxu1 }
 0x139   :  { %890 = vmatprep.subr.bf16.mxu1 %v2909_v52  ;;  %2183 = vmatprep.subr.bf16.mxu0 %v3370_v0 }
 0x13a   :  { %v467_v11 = vpop.f32.mrf.mxu1 }
 0x13c   :  { %891 = vmatpush1.bf16.msra.mxu1 %v2916_v54  ;;  %2184 = vmatpush3.bf16.msra.mxu0 %v2922_v55  ;;  %v469_v13 = vpop.f32.mrf.mxu1 }
 0x13d   :  { %892 = vmatprep.subr.bf16.mxu1 %v2928_v56  ;;  %2185 = vmatprep.subr.bf16.mxu0 %v3370_v0  ;;  %v2984_v15 = vadd.f32 %v469_v13, %v267_v9 }
 0x13e   :  { %v2145_v14 = vpop.f32.mrf.mxu0  ;;  %v471_v17 = vpop.f32.mrf.mxu1 }
 0x13f   :  { %v2987_v16 = vadd.f32 %v2145_v14, %v2976_v10  ;;  %v2994_v19 = vadd.f32 %v471_v17, %v2980_v12 }
 0x140   :  { %v2989_v18 = vpop.f32.mrf.mxu0  ;;  %893 = vmatpush1.bf16.msra.mxu1 %v2930_v57  ;;  %2186 = vmatpush3.bf16.msra.mxu0 %v2932_v58  ;;  %v475_v20 = vpop.f32.mrf.mxu1 }
 0x141   :  { %990 = vmatprep.subr.bf16.mxu1 %v2851_v32  ;;  %2191 = vmatprep.subr.bf16.mxu0 %v3370_v0  ;;  %v2998_v22 = vadd.f32 %v475_v20, %v267_v9  ;;  %v468_v0 = vadd.f32 %v467_v11, %v2980_v12  ;;  %v539_v11 = vadd.f32 %v2989_v18, %v2976_v10  ;;  %v3376_v18 = vmov 0.0  }
 0x142   :  { %v2146_v21 = vpop.f32.mrf.mxu0  ;;  %v477_v24 = vpop.f32.mrf.mxu1 }
 0x143   :  { %v3001_v23 = vadd.f32 %v2146_v21, %v2976_v10  ;;  %v3004_v26 = vadd.f32 %v477_v24, %v2980_v12 }
 0x144   :  { %v541_v25 = vpop.f32.mrf.mxu0  ;;  %v479_v28 = vpop.f32.mrf.mxu1 }
 0x145   :  { %v3007_v27 = vadd.f32 %v541_v25, %v2976_v10  ;;  %v3009_v30 = vadd.f32 %v479_v28, %v267_v9 }
 0x146   :  { %v2149_v29 = vpop.f32.mrf.mxu0  ;;  %v481_v34 = vpop.f32.mrf.mxu1 }
 0x147   :  { %v3012_v31 = vadd.f32 %v2149_v29, %v2976_v10  ;;  %v3015_v46 = vadd.f32 %v481_v34, %v2980_v12  ;;  %v466_v34 = vadd.f32 %v465_v8, %v267_v9 }
 0x148   :  { %v554_v41 = vpop.f32.mrf.mxu0  ;;  %v485_v60 = vpop.f32.mrf.mxu1 }
 0x149   :  { %3372 = vst [vmem:[#allocation23_spill] sm:$0xff] %v3012_v31  ;;  %v3018_v59 = vadd.f32 %v554_v41, %v2976_v10  ;;  %v3020_v63 = vadd.f32 %v485_v60, %v267_v9 }
 0x14a   :  { %v2150_v62 = vpop.f32.mrf.mxu0  ;;  %v487_v3 = vpop.f32.mrf.mxu1 }
 0x14b   :  { %v3023_v2 = vadd.f32 %v2150_v62, %v2976_v10  ;;  %v3026_v4 = vadd.f32 %v487_v3, %v2980_v12 }
 0x14c   :  { %v489_v5 = vpop.f32.mrf.mxu1  ;;  %v3040_v28 = vpop.f32.mrf.mxu0 }
 0x14d   :  { %3373 = vst [vmem:[#allocation24_spill] sm:$0xff] %v3023_v2  ;;  %v3028_v6 = vadd.f32 %v489_v5, %v267_v9 }
 0x14e   :  { %v491_v7 = vpop.f32.mrf.mxu1 }
 0x14f   :  { %v3031_v13 = vadd.f32 %v491_v7, %v2980_v12 }
 0x150   :  { %v495_v14 = vpop.f32.mrf.mxu1 }
 0x151   :  { %v3033_v17 = vadd.f32 %v495_v14, %v267_v9 }
 0x152   :  { %v497_v20 = vpop.f32.mrf.mxu1 }
 0x153   :  { %v3036_v21 = vadd.f32 %v497_v20, %v2980_v12 }
 0x154   :  { %v499_v24 = vpop.f32.mrf.mxu1 }
 0x155   :  { %3374 = vst [vmem:[#allocation25_spill] sm:$0xff] %v3036_v21  ;;  %v3038_v25 = vadd.f32 %v499_v24, %v267_v9  ;;  %v3048_v9 = vld [vmem:[%s3364_s8] ss:$0 sm:$0xff] }
 0x156   :  { %v3042_v29 = vpop.f32.mrf.mxu1 }
 0x157   :  { %3375 = vst [vmem:[#allocation26_spill] sm:$0xff] %v3038_v25 }
 0x1e3   :  { %v801_v41 = vpop.f32.mrf.mxu1  ;;  %v842_v60 = vpop.f32.mrf.mxu0 }
 0x1e4   :  { %v848_v62 = vadd.f32 %v801_v41, %v466_v34 }
 0x1e5   :  { %v803_v3 = vpop.f32.mrf.mxu1  ;;  %v2169_v5 = vpop.f32.mrf.mxu0 }
 0x1e6   :  { %v1970_v7 = vmul.f32 -1.442695, %v848_v62  ;;  %v855_v24 = vadd.f32 %v803_v3, %v468_v0 }
 0x1e7   :  { %v805_v14 = vpop.f32.mrf.mxu1  ;;  %v845_v1 = vpop.f32.mrf.mxu0 }
 0x1e8   :  { %2428 = vpow2.f32 %v1970_v7  ;;  %v1971_v25 = vmul.f32 -1.442695, %v855_v24  ;;  %v862_v1 = vadd.f32 %v3048_v9, %v842_v60  ;;  %v3377_v60 = vmov 0  }
 0x1e9   :  { %v806_v20 = vpop.f32.mrf.mxu1  ;;  %v2170_v2 = vpop.f32.mrf.mxu0 }
 0x1ea   :  { %2430 = vpow2.f32 %v1971_v25 }
 0x1f5   :  { %v2429_v31 = vpop.eup %2428 }
 0x1f6   :  { %v852_v21 = vadd.f32 1.0, %v2429_v31 }
 0x1f7   :  { %v2431_v8 = vpop.eup %2430 }
 0x1f8   :  { %2432 = vrcp.f32 %v852_v21  ;;  %v859_v34 = vadd.f32 1.0, %v2431_v8 }
 0x1fa   :  { %2434 = vrcp.f32 %v859_v34 }
 0x205   :  { %v2433_v41 = vpop.eup %2432 }
 0x206   :  { %v863_v2 = vmul.f32 %v2433_v41, %v862_v1 }
 0x207   :  { %v2435_v25 = vpop.eup %2434 }
 0x208   :  { %v864_v0 = vadd.f32 %v863_v2, %v539_v11  ;;  %v866_v31 = vsub.f32 1.0, %v2435_v25  ;;  %v868_v3 = vmul.f32 %v2435_v25, %v2942_v61 }
 0x20a   :  { %2436 = vtanh.f32 %v864_v0 }
 0x217   :  { %v2437_v21 = vpop.eup %2436 }
 0x218   :  { %v867_v62 = vmul.f32 %v2437_v21, %v866_v31 }
 0x21a   :  { %v3054_v5 = vadd.f32 %v868_v3, %v867_v62 }
 0x21c   :  { %v877_v7 = vpack.c.bf16 %v3054_v5, %v3054_v5 }
 0x21e   :  { %911 = vmatmul.mubr.bf16.vlgmr.msra.gmra.mxu1 %v877_v7  ;;  %2188 = vmatmul.mubr.bf16.vlgmr.msra.gmra.mxu0 %v877_v7 }
 0x21f   :  { %991 = vmatpush1.bf16.msra.mxu1 %v2853_v33  ;;  %2192 = vmatpush3.bf16.msra.mxu0 %v2858_v36 }
 0x220   :  { %992 = vmatprep.subr.bf16.mxu1 %v2856_v35  ;;  %2193 = vmatprep.subr.bf16.mxu0 %v3376_v18 }
 0x221   :  { %1022 = vmatprep.mubr.bf16.mxu1 %v3377_v60  ;;  %2207 = vmatprep.mubr.msk.bf16.mxu0 %vm2745_vm0, %v3376_v18 }
 0x223   :  { %993 = vmatpush1.bf16.msra.mxu1 %v2861_v37  ;;  %2194 = vmatpush3.bf16.msra.mxu0 %v2868_v39 }
 0x224   :  { %994 = vmatprep.subr.bf16.mxu1 %v2865_v38  ;;  %2195 = vmatprep.subr.bf16.mxu0 %v3376_v18 }
 0x227   :  { %995 = vmatpush1.bf16.msra.mxu1 %v2870_v40  ;;  %2196 = vmatpush3.bf16.msra.mxu0 %v2878_v43 }
 0x228   :  { %996 = vmatprep.subr.bf16.mxu1 %v2874_v42  ;;  %2197 = vmatprep.subr.bf16.mxu0 %v3376_v18 }
 0x22b   :  { %997 = vmatpush1.bf16.msra.mxu1 %v2880_v44  ;;  %2198 = vmatpush3.bf16.msra.mxu0 %v2891_v47 }
 0x22c   :  { %998 = vmatprep.subr.bf16.mxu1 %v2882_v45  ;;  %2199 = vmatprep.subr.bf16.mxu0 %v3376_v18 }
 0x22f   :  { %999 = vmatpush1.bf16.msra.mxu1 %v2893_v48  ;;  %2200 = vmatpush3.bf16.msra.mxu0 %v2903_v50 }
 0x230   :  { %1000 = vmatprep.subr.bf16.mxu1 %v2897_v49  ;;  %2201 = vmatprep.subr.bf16.mxu0 %v3376_v18 }
 0x233   :  { %1001 = vmatpush1.bf16.msra.mxu1 %v2905_v51  ;;  %2202 = vmatpush3.bf16.msra.mxu0 %v2914_v53 }
 0x234   :  { %1002 = vmatprep.subr.bf16.mxu1 %v2909_v52  ;;  %2203 = vmatprep.subr.bf16.mxu0 %v3376_v18 }
 0x237   :  { %1003 = vmatpush1.bf16.msra.mxu1 %v2916_v54  ;;  %2204 = vmatpush3.bf16.msra.mxu0 %v2922_v55 }
 0x238   :  { %1004 = vmatprep.subr.bf16.mxu1 %v2928_v56  ;;  %2205 = vmatprep.subr.bf16.mxu0 %v3376_v18 }
 0x23b   :  { %1005 = vmatpush1.bf16.msra.mxu1 %v2930_v57  ;;  %2206 = vmatpush3.bf16.msra.mxu0 %v2932_v58 }
 0x23c   :  { %1102 = vmatprep.subr.bf16.mxu1 %v2851_v32  ;;  %2211 = vmatprep.subr.bf16.mxu0 %v3376_v18 }
 0x2de   :  { %v912_v61 = vpop.f32.mrf.mxu1  ;;  %v953_v14 = vpop.f32.mrf.mxu0 }
 0x2df   :  { %v959_v20 = vadd.f32 %v912_v61, %v2984_v15  ;;  %v973_v7 = vadd.f32 %v3048_v9, %v953_v14 }
 0x2e0   :  { %v914_v24 = vpop.f32.mrf.mxu1  ;;  %v2189_v8 = vpop.f32.mrf.mxu0 }
 0x2e1   :  { %v1973_v34 = vmul.f32 -1.442695, %v959_v20  ;;  %v966_v0 = vadd.f32 %v914_v24, %v2994_v19 }
 0x2e2   :  { %v916_v1 = vpop.f32.mrf.mxu1  ;;  %v956_v41 = vpop.f32.mrf.mxu0 }
 0x2e3   :  { %2438 = vpow2.f32 %v1973_v34  ;;  %v1974_v25 = vmul.f32 -1.442695, %v966_v0 }
 0x2e4   :  { %v917_v11 = vpop.f32.mrf.mxu1  ;;  %v2190_v2 = vpop.f32.mrf.mxu0 }
 0x2e5   :  { %2440 = vpow2.f32 %v1974_v25 }
 0x2f0   :  { %v2439_v31 = vpop.eup %2438 }
 0x2f1   :  { %v963_v21 = vadd.f32 1.0, %v2439_v31 }
 0x2f2   :  { %v2441_v62 = vpop.eup %2440 }
 0x2f3   :  { %2442 = vrcp.f32 %v963_v21  ;;  %v970_v3 = vadd.f32 1.0, %v2441_v62 }
 0x2f5   :  { %2444 = vrcp.f32 %v970_v3 }
 0x300   :  { %v2443_v15 = vpop.eup %2442 }
 0x301   :  { %v974_v61 = vmul.f32 %v2443_v15, %v973_v7 }
 0x302   :  { %v2445_v8 = vpop.eup %2444 }
 0x303   :  { %v975_v20 = vadd.f32 %v974_v61, %v3007_v27  ;;  %v977_v34 = vsub.f32 1.0, %v2445_v8  ;;  %v979_v19 = vmul.f32 %v2445_v8, %v3054_v5 }
 0x305   :  { %2446 = vtanh.f32 %v975_v20 }
 0x312   :  { %v2447_v1 = vpop.eup %2446 }
 0x313   :  { %v978_v41 = vmul.f32 %v2447_v1, %v977_v34 }
 0x315   :  { %v3098_v24 = vadd.f32 %v979_v19, %v978_v41 }
 0x317   :  { %v989_v11 = vpack.c.bf16 %v3098_v24, %v3098_v24 }
 0x319   :  { %1023 = vmatmul.mubr.bf16.vlgmr.msra.gmra.mxu1 %v989_v11  ;;  %2208 = vmatmul.mubr.bf16.vlgmr.msra.gmra.mxu0 %v989_v11 }
 0x31a   :  { %1103 = vmatpush1.bf16.msra.mxu1 %v2853_v33  ;;  %2212 = vmatpush3.bf16.msra.mxu0 %v2858_v36 }
 0x31b   :  { %1104 = vmatprep.subr.bf16.mxu1 %v2856_v35  ;;  %2213 = vmatprep.subr.bf16.mxu0 %v3376_v18 }
 0x31c   :  { %1134 = vmatprep.mubr.bf16.mxu1 %v3377_v60  ;;  %2227 = vmatprep.mubr.msk.bf16.mxu0 %vm2745_vm0, %v3376_v18 }
 0x31e   :  { %1105 = vmatpush1.bf16.msra.mxu1 %v2861_v37  ;;  %2214 = vmatpush3.bf16.msra.mxu0 %v2868_v39 }
 0x31f   :  { %1106 = vmatprep.subr.bf16.mxu1 %v2865_v38  ;;  %2215 = vmatprep.subr.bf16.mxu0 %v3376_v18 }
 0x322   :  { %1107 = vmatpush1.bf16.msra.mxu1 %v2870_v40  ;;  %2216 = vmatpush3.bf16.msra.mxu0 %v2878_v43 }
 0x323   :  { %1108 = vmatprep.subr.bf16.mxu1 %v2874_v42  ;;  %2217 = vmatprep.subr.bf16.mxu0 %v3376_v18 }
 0x326   :  { %1109 = vmatpush1.bf16.msra.mxu1 %v2880_v44  ;;  %2218 = vmatpush3.bf16.msra.mxu0 %v2891_v47 }
 0x327   :  { %1110 = vmatprep.subr.bf16.mxu1 %v2882_v45  ;;  %2219 = vmatprep.subr.bf16.mxu0 %v3376_v18 }
 0x32a   :  { %1111 = vmatpush1.bf16.msra.mxu1 %v2893_v48  ;;  %2220 = vmatpush3.bf16.msra.mxu0 %v2903_v50 }
 0x32b   :  { %1112 = vmatprep.subr.bf16.mxu1 %v2897_v49  ;;  %2221 = vmatprep.subr.bf16.mxu0 %v3376_v18 }
 0x32e   :  { %1113 = vmatpush1.bf16.msra.mxu1 %v2905_v51  ;;  %2222 = vmatpush3.bf16.msra.mxu0 %v2914_v53 }
 0x32f   :  { %1114 = vmatprep.subr.bf16.mxu1 %v2909_v52  ;;  %2223 = vmatprep.subr.bf16.mxu0 %v3376_v18 }
 0x332   :  { %1115 = vmatpush1.bf16.msra.mxu1 %v2916_v54  ;;  %2224 = vmatpush3.bf16.msra.mxu0 %v2922_v55 }
 0x333   :  { %1116 = vmatprep.subr.bf16.mxu1 %v2928_v56  ;;  %2225 = vmatprep.subr.bf16.mxu0 %v3376_v18 }
 0x336   :  { %1117 = vmatpush1.bf16.msra.mxu1 %v2930_v57  ;;  %2226 = vmatpush3.bf16.msra.mxu0 %v2932_v58 }
 0x337   :  { %1214 = vmatprep.subr.bf16.mxu1 %v2851_v32  ;;  %2231 = vmatprep.subr.bf16.mxu0 %v3376_v18 }
 0x3d9   :  { %v1024_v27 = vpop.f32.mrf.mxu1  ;;  %v1065_v14 = vpop.f32.mrf.mxu0 }
 0x3da   :  { %v1071_v2 = vadd.f32 %v1024_v27, %v2998_v22  ;;  %v1085_v41 = vadd.f32 %v3048_v9, %v1065_v14 }
 0x3db   :  { %v1026_v0 = vpop.f32.mrf.mxu1  ;;  %v2209_v25 = vpop.f32.mrf.mxu0 }
 0x3dc   :  { %v1976_v31 = vmul.f32 -1.442695, %v1071_v2  ;;  %v1078_v15 = vadd.f32 %v1026_v0, %v3004_v26 }
 0x3dd   :  { %v1028_v21 = vpop.f32.mrf.mxu1  ;;  %v1068_v62 = vpop.f32.mrf.mxu0 }
 0x3de   :  { %2448 = vpow2.f32 %v1976_v31  ;;  %v1977_v61 = vmul.f32 -1.442695, %v1078_v15 }
 0x3df   :  { %v1029_v3 = vpop.f32.mrf.mxu1  ;;  %v2210_v7 = vpop.f32.mrf.mxu0 }
 0x3e0   :  { %2450 = vpow2.f32 %v1977_v61 }
 0x3eb   :  { %v2449_v20 = vpop.eup %2448 }
 0x3ec   :  { %v1075_v8 = vadd.f32 1.0, %v2449_v20 }
 0x3ed   :  { %v2451_v34 = vpop.eup %2450 }
 0x3ee   :  { %2452 = vrcp.f32 %v1075_v8  ;;  %v1082_v1 = vadd.f32 1.0, %v2451_v34 }
 0x3f0   :  { %2454 = vrcp.f32 %v1082_v1 }
 0x3fb   :  { %v2453_v22 = vpop.eup %2452 }
 0x3fc   :  { %v1086_v19 = vmul.f32 %v2453_v22, %v1085_v41 }
 0x3fd   :  { %v2455_v27 = vpop.eup %2454 }
 0x3fe   :  { %v1087_v11 = vadd.f32 %v1086_v19, %v2987_v16  ;;  %v1089_v2 = vsub.f32 1.0, %v2455_v27  ;;  %v1091_v26 = vmul.f32 %v2455_v27, %v3098_v24 }
 0x400   :  { %2456 = vtanh.f32 %v1087_v11 }
 0x40d   :  { %v2457_v25 = vpop.eup %2456 }
 0x40e   :  { %v1090_v31 = vmul.f32 %v2457_v25, %v1089_v2 }
 0x410   :  { %v3142_v0 = vadd.f32 %v1091_v26, %v1090_v31 }
 0x412   :  { %v1101_v21 = vpack.c.bf16 %v3142_v0, %v3142_v0 }
 0x414   :  { %1135 = vmatmul.mubr.bf16.vlgmr.msra.gmra.mxu1 %v1101_v21  ;;  %2228 = vmatmul.mubr.bf16.vlgmr.msra.gmra.mxu0 %v1101_v21 }
 0x415   :  { %1215 = vmatpush1.bf16.msra.mxu1 %v2853_v33  ;;  %2232 = vmatpush3.bf16.msra.mxu0 %v2858_v36 }
 0x416   :  { %1216 = vmatprep.subr.bf16.mxu1 %v2856_v35  ;;  %2233 = vmatprep.subr.bf16.mxu0 %v3376_v18 }
 0x417   :  { %1246 = vmatprep.mubr.bf16.mxu1 %v3377_v60  ;;  %2247 = vmatprep.mubr.msk.bf16.mxu0 %vm2745_vm0, %v3376_v18 }
 0x419   :  { %1217 = vmatpush1.bf16.msra.mxu1 %v2861_v37  ;;  %2234 = vmatpush3.bf16.msra.mxu0 %v2868_v39 }
 0x41a   :  { %1218 = vmatprep.subr.bf16.mxu1 %v2865_v38  ;;  %2235 = vmatprep.subr.bf16.mxu0 %v3376_v18 }
 0x41d   :  { %1219 = vmatpush1.bf16.msra.mxu1 %v2870_v40  ;;  %2236 = vmatpush3.bf16.msra.mxu0 %v2878_v43 }
 0x41e   :  { %1220 = vmatprep.subr.bf16.mxu1 %v2874_v42  ;;  %2237 = vmatprep.subr.bf16.mxu0 %v3376_v18 }
 0x421   :  { %1221 = vmatpush1.bf16.msra.mxu1 %v2880_v44  ;;  %2238 = vmatpush3.bf16.msra.mxu0 %v2891_v47 }
 0x422   :  { %1222 = vmatprep.subr.bf16.mxu1 %v2882_v45  ;;  %2239 = vmatprep.subr.bf16.mxu0 %v3376_v18 }
 0x425   :  { %1223 = vmatpush1.bf16.msra.mxu1 %v2893_v48  ;;  %2240 = vmatpush3.bf16.msra.mxu0 %v2903_v50 }
 0x426   :  { %1224 = vmatprep.subr.bf16.mxu1 %v2897_v49  ;;  %2241 = vmatprep.subr.bf16.mxu0 %v3376_v18 }
 0x429   :  { %1225 = vmatpush1.bf16.msra.mxu1 %v2905_v51  ;;  %2242 = vmatpush3.bf16.msra.mxu0 %v2914_v53 }
 0x42a   :  { %1226 = vmatprep.subr.bf16.mxu1 %v2909_v52  ;;  %2243 = vmatprep.subr.bf16.mxu0 %v3376_v18 }
 0x42d   :  { %1227 = vmatpush1.bf16.msra.mxu1 %v2916_v54  ;;  %2244 = vmatpush3.bf16.msra.mxu0 %v2922_v55 }
 0x42e   :  { %1228 = vmatprep.subr.bf16.mxu1 %v2928_v56  ;;  %2245 = vmatprep.subr.bf16.mxu0 %v3376_v18 }
 0x431   :  { %1229 = vmatpush1.bf16.msra.mxu1 %v2930_v57  ;;  %2246 = vmatpush3.bf16.msra.mxu0 %v2932_v58 }
 0x432   :  { %1326 = vmatprep.subr.bf16.mxu1 %v2851_v32  ;;  %2251 = vmatprep.subr.bf16.mxu0 %v3376_v18 }
 0x4d4   :  { %v1136_v16 = vpop.f32.mrf.mxu1  ;;  %v1177_v14 = vpop.f32.mrf.mxu0 }
 0x4d5   :  { %v1183_v62 = vadd.f32 %v1136_v16, %v3009_v30  ;;  %v1197_v2 = vadd.f32 %v3048_v9, %v1177_v14 }
 0x4d6   :  { %v1138_v3 = vpop.f32.mrf.mxu1  ;;  %v2229_v7 = vpop.f32.mrf.mxu0 }
 0x4d7   :  { %v1979_v15 = vmul.f32 -1.442695, %v1183_v62  ;;  %v1190_v1 = vadd.f32 %v1138_v3, %v3015_v46 }
 0x4d8   :  { %v1140_v61 = vpop.f32.mrf.mxu1  ;;  %v1180_v20 = vpop.f32.mrf.mxu0 }
 0x4d9   :  { %2458 = vpow2.f32 %v1979_v15  ;;  %v1980_v41 = vmul.f32 -1.442695, %v1190_v1 }
 0x4da   :  { %v1141_v8 = vpop.f32.mrf.mxu1  ;;  %v2230_v34 = vpop.f32.mrf.mxu0 }
 0x4db   :  { %2460 = vpow2.f32 %v1980_v41 }
 0x4e6   :  { %v2459_v22 = vpop.eup %2458 }
 0x4e7   :  { %v1187_v19 = vadd.f32 1.0, %v2459_v22 }
 0x4e8   :  { %v2461_v11 = vpop.eup %2460 }
 0x4e9   :  { %2462 = vrcp.f32 %v1187_v19  ;;  %v1194_v27 = vadd.f32 1.0, %v2461_v11 }
 0x4eb   :  { %2464 = vrcp.f32 %v1194_v27 }
 0x4f6   :  { %v2463_v30 = vpop.eup %2462 }
 0x4f7   :  { %v1198_v25 = vmul.f32 %v2463_v30, %v1197_v2 }
 0x4f8   :  { %v2465_v26 = vpop.eup %2464 }
 0x4f9   :  { %v1199_v31 = vadd.f32 %v1198_v25, %v3001_v23  ;;  %v1201_v21 = vsub.f32 1.0, %v2465_v26  ;;  %v1203_v46 = vmul.f32 %v2465_v26, %v3142_v0 }
 0x4fb   :  { %2466 = vtanh.f32 %v1199_v31 }
 0x508   :  { %v2467_v16 = vpop.eup %2466 }
 0x509   :  { %v1202_v62 = vmul.f32 %v2467_v16, %v1201_v21 }
 0x50b   :  { %v3186_v3 = vadd.f32 %v1203_v46, %v1202_v62 }
 0x50d   :  { %v1213_v7 = vpack.c.bf16 %v3186_v3, %v3186_v3 }
 0x50f   :  { %1247 = vmatmul.mubr.bf16.vlgmr.msra.gmra.mxu1 %v1213_v7  ;;  %2248 = vmatmul.mubr.bf16.vlgmr.msra.gmra.mxu0 %v1213_v7 }
 0x510   :  { %1327 = vmatpush1.bf16.msra.mxu1 %v2853_v33  ;;  %2252 = vmatpush3.bf16.msra.mxu0 %v2858_v36 }
 0x511   :  { %1328 = vmatprep.subr.bf16.mxu1 %v2856_v35  ;;  %2253 = vmatprep.subr.bf16.mxu0 %v3376_v18 }
 0x512   :  { %1358 = vmatprep.mubr.bf16.mxu1 %v3377_v60  ;;  %2267 = vmatprep.mubr.msk.bf16.mxu0 %vm2745_vm0, %v3376_v18 }
 0x514   :  { %1329 = vmatpush1.bf16.msra.mxu1 %v2861_v37  ;;  %2254 = vmatpush3.bf16.msra.mxu0 %v2868_v39 }
 0x515   :  { %1330 = vmatprep.subr.bf16.mxu1 %v2865_v38  ;;  %2255 = vmatprep.subr.bf16.mxu0 %v3376_v18 }
 0x518   :  { %1331 = vmatpush1.bf16.msra.mxu1 %v2870_v40  ;;  %2256 = vmatpush3.bf16.msra.mxu0 %v2878_v43 }
 0x519   :  { %1332 = vmatprep.subr.bf16.mxu1 %v2874_v42  ;;  %2257 = vmatprep.subr.bf16.mxu0 %v3376_v18 }
 0x51c   :  { %1333 = vmatpush1.bf16.msra.mxu1 %v2880_v44  ;;  %2258 = vmatpush3.bf16.msra.mxu0 %v2891_v47 }
 0x51d   :  { %1334 = vmatprep.subr.bf16.mxu1 %v2882_v45  ;;  %2259 = vmatprep.subr.bf16.mxu0 %v3376_v18 }
 0x520   :  { %1335 = vmatpush1.bf16.msra.mxu1 %v2893_v48  ;;  %2260 = vmatpush3.bf16.msra.mxu0 %v2903_v50 }
 0x521   :  { %1336 = vmatprep.subr.bf16.mxu1 %v2897_v49  ;;  %2261 = vmatprep.subr.bf16.mxu0 %v3376_v18 }
 0x524   :  { %1337 = vmatpush1.bf16.msra.mxu1 %v2905_v51  ;;  %2262 = vmatpush3.bf16.msra.mxu0 %v2914_v53 }
 0x525   :  { %1338 = vmatprep.subr.bf16.mxu1 %v2909_v52  ;;  %2263 = vmatprep.subr.bf16.mxu0 %v3376_v18 }
 0x528   :  { %1339 = vmatpush1.bf16.msra.mxu1 %v2916_v54  ;;  %2264 = vmatpush3.bf16.msra.mxu0 %v2922_v55 }
 0x529   :  { %1340 = vmatprep.subr.bf16.mxu1 %v2928_v56  ;;  %2265 = vmatprep.subr.bf16.mxu0 %v3376_v18 }
 0x52c   :  { %1341 = vmatpush1.bf16.msra.mxu1 %v2930_v57  ;;  %2266 = vmatpush3.bf16.msra.mxu0 %v2932_v58 }
 0x52d   :  { %1438 = vmatprep.subr.bf16.mxu1 %v2851_v32  ;;  %2271 = vmatprep.subr.bf16.mxu0 %v3376_v18 }
 0x5cf   :  { %v1248_v23 = vpop.f32.mrf.mxu1  ;;  %v1289_v14 = vpop.f32.mrf.mxu0 }
 0x5d0   :  { %v1295_v15 = vadd.f32 %v1248_v23, %v3020_v63  ;;  %v1309_v25 = vadd.f32 %v3048_v9, %v1289_v14 }
 0x5d1   :  { %v1250_v61 = vpop.f32.mrf.mxu1  ;;  %v2249_v20 = vpop.f32.mrf.mxu0 }
 0x5d2   :  { %v1982_v8 = vmul.f32 -1.442695, %v1295_v15  ;;  %v1302_v19 = vadd.f32 %v1250_v61, %v3026_v4 }
 0x5d3   :  { %v1252_v34 = vpop.f32.mrf.mxu1  ;;  %v1292_v1 = vpop.f32.mrf.mxu0 }
 0x5d4   :  { %2468 = vpow2.f32 %v1982_v8  ;;  %v1983_v11 = vmul.f32 -1.442695, %v1302_v19  ;;  %v2541_v1 = vld [vmem:[#allocation14 + $0xa8] ss:$12 sps:$4 sm:$0xff]  }
 0x5d5   :  { %v1253_v41 = vpop.f32.mrf.mxu1  ;;  %v2250_v22 = vpop.f32.mrf.mxu0  ;;  %v2546_v19 = vld [vmem:[#allocation14 + $0x7c] ss:$12 sps:$4 sm:$0xff]  }
 0x5d6   :  { %2470 = vpow2.f32 %v1983_v11  ;;  %v2544_v41 = vld [vmem:[#allocation14 + $0x90] ss:$12 sps:$4 sm:$0xff]   ;;  %v2545_v22 = vld [vmem:[#allocation14 + $0x98] ss:$12 sps:$4 sm:$0xff]  }
 0x5d7   :  { %v2547_v11 = vld [vmem:[#allocation14 + $0x78] ss:$12 sps:$4 sm:$0xff]  }
 0x5e1   :  { %v2469_v27 = vpop.eup %2468 }
 0x5e2   :  { %v1299_v32 = vadd.f32 1.0, %v2469_v27  ;;  %v2548_v27 = vld [vmem:[#allocation14 + $0x80] ss:$12 sps:$4 sm:$0xff]  }
 0x5e3   :  { %v2471_v2 = vpop.eup %2470 }
 0x5e4   :  { %2472 = vrcp.f32 %v1299_v32  ;;  %v1306_v30 = vadd.f32 1.0, %v2471_v2  ;;  %v2549_v32 = vld [vmem:[#allocation14 + $0x64] ss:$12 sps:$4 sm:$0xff]   ;;  %v2551_v2 = vld [vmem:[#allocation14 + $0x68] ss:$12 sps:$4 sm:$0xff]  }
 0x5e6   :  { %2474 = vrcp.f32 %v1306_v30  ;;  %v2552_v30 = vld [vmem:[#allocation14 + $0x4c] ss:$12 sps:$4 sm:$0xff]  }
 0x5f1   :  { %v2473_v63 = vpop.eup %2472 }
 0x5f2   :  { %v1310_v31 = vmul.f32 %v2473_v63, %v1309_v25  ;;  %v2553_v25 = vld [vmem:[#allocation14 + $0x48] ss:$12 sps:$4 sm:$0xff]   ;;  %v2554_v63 = vld [vmem:[#allocation14 + $0x50] ss:$12 sps:$4 sm:$0xff]  }
 0x5f3   :  { %v2475_v21 = vpop.eup %2474 }
 0x5f4   :  { %v1311_v26 = vadd.f32 %v1310_v31, %v3018_v59  ;;  %v1313_v16 = vsub.f32 1.0, %v2475_v21  ;;  %v1315_v4 = vmul.f32 %v2475_v21, %v3186_v3  ;;  %v2555_v31 = vld [vmem:[#allocation14 + $0x34] ss:$12 sps:$4 sm:$0xff]   ;;  %v2557_v21 = vld [vmem:[#allocation14 + $0x38] ss:$12 sps:$4 sm:$0xff]  }
 0x5f6   :  { %2476 = vtanh.f32 %v1311_v26  ;;  %v2556_v26 = vld [vmem:[#allocation14 + $0x30] ss:$12 sps:$4 sm:$0xff]  }
 0x603   :  { %v2477_v62 = vpop.eup %2476 }
 0x604   :  { %v1314_v46 = vmul.f32 %v2477_v62, %v1313_v16  ;;  %v2558_v16 = vld [vmem:[#allocation14 + $0x1c] ss:$12 sps:$4 sm:$0xff]   ;;  %v2559_v62 = vld [vmem:[#allocation14 + $0x18] ss:$12 sps:$4 sm:$0xff]  }
 0x606   :  { %v3230_v7 = vadd.f32 %v1315_v4, %v1314_v46  ;;  %v2560_v46 = vld [vmem:[#allocation14 + $0x20] ss:$12 sps:$4 sm:$0xff]   ;;  %v2420_v4 = vld [vmem:[#allocation16 + $0x38] sm:$0xff]  }
 0x608   :  { %v1325_v23 = vpack.c.bf16 %v3230_v7, %v3230_v7 }
 0x60a   :  { %1359 = vmatmul.mubr.bf16.vlgmr.msra.gmra.mxu1 %v1325_v23  ;;  %2268 = vmatmul.mubr.bf16.vlgmr.msra.gmra.mxu0 %v1325_v23 }
 0x60b   :  { %1439 = vmatpush1.bf16.msra.mxu1 %v2853_v33  ;;  %2272 = vmatpush3.bf16.msra.mxu0 %v2858_v36  ;;  %v2540_v33 = vld [vmem:[#allocation14 + $0xac] ss:$12 sps:$4 sm:$0xff]  }
 0x60c   :  { %1440 = vmatprep.subr.bf16.mxu1 %v2856_v35  ;;  %2273 = vmatprep.subr.bf16.mxu0 %v3376_v18 }
 0x60d   :  { %1470 = vmatprep.mubr.bf16.mxu1 %v3377_v60  ;;  %2287 = vmatprep.mubr.msk.bf16.mxu0 %vm2745_vm0, %v3376_v18 }
 0x60f   :  { %1441 = vmatpush1.bf16.msra.mxu1 %v2861_v37  ;;  %2274 = vmatpush3.bf16.msra.mxu0 %v2868_v39 }
 0x610   :  { %1442 = vmatprep.subr.bf16.mxu1 %v2865_v38  ;;  %2275 = vmatprep.subr.bf16.mxu0 %v3376_v18 }
 0x613   :  { %1443 = vmatpush1.bf16.msra.mxu1 %v2870_v40  ;;  %2276 = vmatpush3.bf16.msra.mxu0 %v2878_v43 }
 0x614   :  { %1444 = vmatprep.subr.bf16.mxu1 %v2874_v42  ;;  %2277 = vmatprep.subr.bf16.mxu0 %v3376_v18 }
 0x617   :  { %1445 = vmatpush1.bf16.msra.mxu1 %v2880_v44  ;;  %2278 = vmatpush3.bf16.msra.mxu0 %v2891_v47 }
 0x618   :  { %1446 = vmatprep.subr.bf16.mxu1 %v2882_v45  ;;  %2279 = vmatprep.subr.bf16.mxu0 %v3376_v18 }
 0x61b   :  { %1447 = vmatpush1.bf16.msra.mxu1 %v2893_v48  ;;  %2280 = vmatpush3.bf16.msra.mxu0 %v2903_v50 }
 0x61c   :  { %1448 = vmatprep.subr.bf16.mxu1 %v2897_v49  ;;  %2281 = vmatprep.subr.bf16.mxu0 %v3376_v18 }
 0x61f   :  { %1449 = vmatpush1.bf16.msra.mxu1 %v2905_v51  ;;  %2282 = vmatpush3.bf16.msra.mxu0 %v2914_v53 }
 0x620   :  { %1450 = vmatprep.subr.bf16.mxu1 %v2909_v52  ;;  %2283 = vmatprep.subr.bf16.mxu0 %v3376_v18 }
 0x623   :  { %1451 = vmatpush1.bf16.msra.mxu1 %v2916_v54  ;;  %2284 = vmatpush3.bf16.msra.mxu0 %v2922_v55  ;;  %v558_v55 = vadd.f32 %v3040_v28, %v2976_v10  ;;  %v2542_v10 = vld [vmem:[#allocation14 + $0xb0] ss:$12 sps:$4 sm:$0xff]   ;;  %v2543_v28 = vld [vmem:[#allocation14 + $0x94] ss:$12 sps:$4 sm:$0xff]  }
 0x624   :  { %1452 = vmatprep.subr.bf16.mxu1 %v2928_v56  ;;  %2285 = vmatprep.subr.bf16.mxu0 %v3376_v18 }
 0x627   :  { %1453 = vmatpush1.bf16.msra.mxu1 %v2930_v57  ;;  %2286 = vmatpush3.bf16.msra.mxu0 %v2932_v58 }
 0x628   :  { %1550 = vmatprep.subr.bf16.mxu1 %v2540_v33  ;;  %2291 = vmatprep.subr.bf16.mxu0 %v3376_v18 }
 0x6ca   :  { %v1360_v35 = vpop.f32.mrf.mxu1  ;;  %v1401_v36 = vpop.f32.mrf.mxu0 }
 0x6cb   :  { %v1407_v37 = vadd.f32 %v1360_v35, %v3028_v6  ;;  %v1421_v53 = vadd.f32 %v3048_v9, %v1401_v36 }
 0x6cc   :  { %v1362_v38 = vpop.f32.mrf.mxu1  ;;  %v2269_v39 = vpop.f32.mrf.mxu0 }
 0x6cd   :  { %v1985_v40 = vmul.f32 -1.442695, %v1407_v37  ;;  %v1414_v47 = vadd.f32 %v1362_v38, %v3031_v13 }
 0x6ce   :  { %v1364_v42 = vpop.f32.mrf.mxu1  ;;  %v1404_v43 = vpop.f32.mrf.mxu0 }
 0x6cf   :  { %2478 = vpow2.f32 %v1985_v40  ;;  %v1986_v48 = vmul.f32 -1.442695, %v1414_v47  ;;  %v3378_v43 = vld [vmem:[#allocation25_spill] sm:$0xff] }
 0x6d0   :  { %v1365_v44 = vpop.f32.mrf.mxu1  ;;  %v2270_v45 = vpop.f32.mrf.mxu0 }
 0x6d1   :  { %2480 = vpow2.f32 %v1986_v48 }
 0x6dc   :  { %v2479_v49 = vpop.eup %2478 }
 0x6dd   :  { %v1411_v50 = vadd.f32 1.0, %v2479_v49 }
 0x6de   :  { %v2481_v51 = vpop.eup %2480 }
 0x6df   :  { %2482 = vrcp.f32 %v1411_v50  ;;  %v1418_v52 = vadd.f32 1.0, %v2481_v51  ;;  %v3379_v50 = vld [vmem:[#allocation23_spill] sm:$0xff] }
 0x6e1   :  { %2484 = vrcp.f32 %v1418_v52 }
 0x6ec   :  { %v2483_v54 = vpop.eup %2482 }
 0x6ed   :  { %v1422_v59 = vmul.f32 %v2483_v54, %v1421_v53  ;;  %v3295_v54 = vld [vmem:[#allocation8] sm:$0xff] }
 0x6ee   :  { %v2485_v14 = vpop.eup %2484  ;;  %vm1972_vm2 = vcmp.gt.s32.totalorder %v3295_v54, 0  ;;  %vm1975_vm3 = vcmp.gt.s32.totalorder %v3295_v54, 1  ;;  %vm1978_vm5 = vcmp.gt.s32.totalorder %v3295_v54, 2  ;;  %vm1981_vm6 = vcmp.gt.s32.totalorder %v3295_v54, 3 }
 0x6ef   :  { %v1423_v6 = vadd.f32 %v1422_v59, %v558_v55  ;;  %v1425_v15 = vsub.f32 1.0, %v2485_v14  ;;  %v1427_v20 = vmul.f32 %v2485_v14, %v3230_v7  ;;  %vm2003_vm4 = vmpackc.low %vm1975_vm3, %vm1972_vm2  ;;  %vm1984_vm7 = vcmp.gt.s32.totalorder %v3295_v54, 4 }
 0x6f0   :  { %vm1987_vm8 = vcmp.gt.s32.totalorder %v3295_v54, 5  ;;  %vm2006_vm9 = vmpackc.low %vm1981_vm6, %vm1978_vm5  ;;  %vm1990_vm11 = vcmp.gt.s32.totalorder %v3295_v54, 6  ;;  %vm1993_vm12 = vcmp.gt.s32.totalorder %v3295_v54, 7 }
 0x6f1   :  { %2486 = vtanh.f32 %v1423_v6  ;;  %vm2009_vm10 = vmpackc.low %vm1987_vm8, %vm1984_vm7 }
 0x6f2   :  { %vm2012_vm13 = vmpackc.low %vm1993_vm12, %vm1990_vm11 }
 0x6fe   :  { %v2487_v13 = vpop.eup %2486 }
 0x6ff   :  { %v1426_v61 = vmul.f32 %v2487_v13, %v1425_v15  ;;  %v2421_v13 = vld [vmem:[#allocation16 + $0x30] sm:$0xff]  }
 0x701   :  { %v3274_v8 = vadd.f32 %v1427_v20, %v1426_v61  ;;  %v2004_v61 = vpack.c.bf16 %v3098_v24, %v3054_v5  ;;  %v2422_v20 = vld [vmem:[#allocation16 + $0x28] sm:$0xff]   ;;  %v2427_v5 = vld [vmem:[#allocation16] sm:$0xff]   ;;  %v2007_v24 = vpack.c.bf16 %v3186_v3, %v3142_v0 }
 0x703   :  { %v1437_v34 = vpack.c.bf16 %v3274_v8, %v3274_v8 }
 0x705   :  { %1471 = vmatmul.mubr.bf16.vlgmr.msra.gmra.mxu1 %v1437_v34  ;;  %2288 = vmatmul.mubr.bf16.vlgmr.msra.gmra.mxu0 %v1437_v34  ;;  %v2423_v34 = vld [vmem:[#allocation16 + $0x20] sm:$0xff]  }
 0x706   :  { %1551 = vmatpush1.bf16.msra.mxu1 %v2541_v1  ;;  %2292 = vmatpush3.bf16.msra.mxu0 %v2542_v10  ;;  %v2424_v1 = vld [vmem:[#allocation16 + $0x18] sm:$0xff]   ;;  %v2425_v10 = vld [vmem:[#allocation16 + $0x10] sm:$0xff]  }
 0x707   :  { %1552 = vmatprep.subr.bf16.mxu1 %v2543_v28  ;;  %2293 = vmatprep.subr.bf16.mxu0 %v3376_v18  ;;  %v2426_v28 = vld [vmem:[#allocation16 + $0x8] sm:$0xff]  }
 0x708   :  { %1582 = vmatprep.mubr.bf16.mxu1 %v3377_v60  ;;  %2307 = vmatprep.mubr.msk.bf16.mxu0 %vm2745_vm0, %v3376_v18  ;;  %v2550_v60 = vld [vmem:[#allocation14 + $0x60] ss:$12 sps:$4 sm:$0xff]  }
 0x70a   :  { %1553 = vmatpush1.bf16.msra.mxu1 %v2544_v41  ;;  %2294 = vmatpush3.bf16.msra.mxu0 %v2545_v22  ;;  %v2010_v41 = vpack.c.bf16 %v3274_v8, %v3230_v7 }
 0x70b   :  { %1554 = vmatprep.subr.bf16.mxu1 %v2546_v19  ;;  %2295 = vmatprep.subr.bf16.mxu0 %v3376_v18 }
 0x70e   :  { %1555 = vmatpush1.bf16.msra.mxu1 %v2547_v11  ;;  %2296 = vmatpush3.bf16.msra.mxu0 %v2548_v27  ;;  %v3380_v11 = vld [vmem:[#allocation26_spill] sm:$0xff] }
 0x70f   :  { %1556 = vmatprep.subr.bf16.mxu1 %v2549_v32  ;;  %2297 = vmatprep.subr.bf16.mxu0 %v3376_v18 }
 0x712   :  { %1557 = vmatpush1.bf16.msra.mxu1 %v2550_v60  ;;  %2298 = vmatpush3.bf16.msra.mxu0 %v2551_v2 }
 0x713   :  { %1558 = vmatprep.subr.bf16.mxu1 %v2552_v30  ;;  %2299 = vmatprep.subr.bf16.mxu0 %v3376_v18 }
 0x716   :  { %1559 = vmatpush1.bf16.msra.mxu1 %v2553_v25  ;;  %2300 = vmatpush3.bf16.msra.mxu0 %v2554_v63  ;;  %v502_v63 = vadd.f32 %v3042_v29, %v2980_v12 }
 0x717   :  { %1560 = vmatprep.subr.bf16.mxu1 %v2555_v31  ;;  %2301 = vmatprep.subr.bf16.mxu0 %v3376_v18 }
 0x71a   :  { %1561 = vmatpush1.bf16.msra.mxu1 %v2556_v26  ;;  %2302 = vmatpush3.bf16.msra.mxu0 %v2557_v21 }
 0x71b   :  { %1562 = vmatprep.subr.bf16.mxu1 %v2558_v16  ;;  %2303 = vmatprep.subr.bf16.mxu0 %v3376_v18  ;;  %v1994_v16 = vld [vmem:[%s3366_s10] ss:$0 sm:$0xff]  ;;  %s2747_s10 = smov [#allocation17]  }
 0x71c   :  { %s1900_s18 = sshll.u32 %s2747_s10, 4  ;;  %s1901_s18 = int_to_ptr.vmem [resolvable:$true] %s1900_s18 }
 0x71d   :  { %s2701_s19 = scalar_lea.vmem %s1901_s18, 1024  ;;  %p2706_p8 = scmp.lt.s32.totalorder %s1901_s18, %s1901_s18 }
 0x71e   :  { %1563 = vmatpush1.bf16.msra.mxu1 %v2559_v62  ;;  %2304 = vmatpush3.bf16.msra.mxu0 %v2560_v46  ;;  %p2702_p7 = scmp.ne.s32.totalorder %s1901_s18, %s2701_s19  ;;  %p2707_p9 = scmp.lt.s32.totalorder %s2701_s19, %s2701_s19 }
 0x71f   :  { %1564 = vmatprep.subr.bf16.mxu1 %v2928_v56  ;;  %2305 = vmatprep.subr.bf16.mxu0 %v3376_v18 }
 0x720   :  { %p2708_p10 = por %p2707_p9, %p2706_p8 }
 0x722   :  { %1565 = vmatpush1.bf16.msra.mxu1 %v2930_v57  ;;  %2306 = vmatpush3.bf16.msra.mxu0 %v2932_v58  ;;  %p2709_p11 = pnand %p2708_p10, %p2702_p7 }
 0x723   :  { %2311 = vmatprep.subr.bf16.mxu1 %v2420_v4 }
 0x7c5   :  { %v1472_v23 = vpop.f32.mrf.mxu1  ;;  %v1513_v33 = vpop.f32.mrf.mxu0 }
 0x7c6   :  { %v1519_v35 = vadd.f32 %v1472_v23, %v3033_v17  ;;  %v1533_v48 = vadd.f32 %v3048_v9, %v1513_v33 }
 0x7c7   :  { %v1474_v36 = vpop.f32.mrf.mxu1  ;;  %v2289_v37 = vpop.f32.mrf.mxu0 }
 0x7c8   :  { %v1988_v38 = vmul.f32 -1.442695, %v1519_v35  ;;  %v1526_v18 = vadd.f32 %v1474_v36, %v3378_v43  ;;  %v3381_v37 = vld [vmem:[#allocation24_spill] sm:$0xff] }
 0x7c9   :  { %v1476_v39 = vpop.f32.mrf.mxu1  ;;  %v1516_v40 = vpop.f32.mrf.mxu0 }
 0x7ca   :  { %2488 = vpow2.f32 %v1988_v38  ;;  %v1989_v44 = vmul.f32 -1.442695, %v1526_v18 }
 0x7cb   :  { %v1477_v42 = vpop.f32.mrf.mxu1  ;;  %v2290_v56 = vpop.f32.mrf.mxu0 }
 0x7cc   :  { %2490 = vpow2.f32 %v1989_v44 }
 0x7d7   :  { %v2489_v57 = vpop.eup %2488 }
 0x7d8   :  { %v1523_v58 = vadd.f32 1.0, %v2489_v57 }
 0x7d9   :  { %v2491_v45 = vpop.eup %2490 }
 0x7da   :  { %2492 = vrcp.f32 %v1523_v58  ;;  %v1530_v47 = vadd.f32 1.0, %v2491_v45 }
 0x7dc   :  { %2494 = vrcp.f32 %v1530_v47 }
 0x7e7   :  { %v2493_v17 = vpop.eup %2492 }
 0x7e8   :  { %v1534_v49 = vmul.f32 %v2493_v17, %v1533_v48 }
 0x7e9   :  { %v2495_v52 = vpop.eup %2494 }
 0x7ea   :  { %v1535_v51 = vadd.f32 %v1534_v49, %v3379_v50  ;;  %v1537_v53 = vsub.f32 1.0, %v2495_v52  ;;  %v1539_v6 = vmul.f32 %v2495_v52, %v3274_v8 }
 0x7ec   :  { %2496 = vtanh.f32 %v1535_v51 }
 0x7f9   :  { %v2497_v55 = vpop.eup %2496 }
 0x7fa   :  { %v1538_v59 = vmul.f32 %v2497_v55, %v1537_v53 }
 0x7fc   :  { %v3300_v14 = vadd.f32 %v1539_v6, %v1538_v59 }
 0x7fe   :  { %v1549_v15 = vpack.c.bf16 %v3300_v14, %v3300_v14 }
 0x800   :  { %1583 = vmatmul.mubr.bf16.vlgmr.msra.gmra.mxu1 %v1549_v15  ;;  %2308 = vmatmul.mubr.bf16.vlgmr.msra.gmra.mxu0 %v1549_v15 }
 0x801   :  { %2312 = vmatpush3.bf16.msra.mxu1 %v2420_v4  ;;  %2327 = vmatprep.mubr.msk.bf16.mxu1 %vm2003_vm4, %v2004_v61 }
 0x802   :  { %2313 = vmatprep.subr.bf16.mxu1 %v2421_v13 }
 0x805   :  { %2314 = vmatpush3.bf16.msra.mxu1 %v2421_v13 }
 0x806   :  { %2315 = vmatprep.subr.bf16.mxu1 %v2422_v20 }
 0x809   :  { %2316 = vmatpush3.bf16.msra.mxu1 %v2422_v20 }
 0x80a   :  { %2317 = vmatprep.subr.bf16.mxu1 %v2423_v34 }
 0x80d   :  { %2318 = vmatpush3.bf16.msra.mxu1 %v2423_v34 }
 0x80e   :  { %2319 = vmatprep.subr.bf16.mxu1 %v2424_v1 }
 0x811   :  { %2320 = vmatpush3.bf16.msra.mxu1 %v2424_v1 }
 0x812   :  { %2321 = vmatprep.subr.bf16.mxu1 %v2425_v10 }
 0x815   :  { %2322 = vmatpush3.bf16.msra.mxu1 %v2425_v10 }
 0x816   :  { %2323 = vmatprep.subr.bf16.mxu1 %v2426_v28 }
 0x819   :  { %2324 = vmatpush3.bf16.msra.mxu1 %v2426_v28 }
 0x81a   :  { %2325 = vmatprep.subr.bf16.mxu1 %v2427_v5 }
 0x81d   :  { %2326 = vmatpush3.bf16.msra.mxu1 %v2427_v5 }
 0x820   :  { %2328 = vmatmul.mubr.msk.bf16.vlgmr.msra.gmra.mxu1 %vm2006_vm9, %v2007_v24 }
 0x821   :  { %2331 = vmatprep.mubr.msk.bf16.mxu1 %vm2009_vm10, %v2010_v41 }
 0x8c0   :  { %v1584_v22 = vpop.f32.mrf.mxu1  ;;  %v1625_v19 = vpop.f32.mrf.mxu0 }
 0x8c1   :  { %v1631_v27 = vadd.f32 %v1584_v22, %v3380_v11  ;;  %v1645_v4 = vadd.f32 %v3048_v9, %v1625_v19 }
 0x8c2   :  { %v1586_v32 = vpop.f32.mrf.mxu1  ;;  %v2309_v60 = vpop.f32.mrf.mxu0 }
 0x8c3   :  { %v1991_v2 = vmul.f32 -1.442695, %v1631_v27  ;;  %v1638_v31 = vadd.f32 %v1586_v32, %v502_v63 }
 0x8c4   :  { %v1588_v30 = vpop.f32.mrf.mxu1  ;;  %v1628_v25 = vpop.f32.mrf.mxu0 }
 0x8c5   :  { %2498 = vpow2.f32 %v1991_v2  ;;  %v1992_v26 = vmul.f32 -1.442695, %v1638_v31 }
 0x8c6   :  { %v1589_v0 = vpop.f32.mrf.mxu1  ;;  %v2310_v3 = vpop.f32.mrf.mxu0 }
 0x8c7   :  { %2500 = vpow2.f32 %v1992_v26 }
 0x8d2   :  { %v2499_v7 = vpop.eup %2498 }
 0x8d3   :  { %v1635_v8 = vadd.f32 1.0, %v2499_v7 }
 0x8d4   :  { %v2501_v21 = vpop.eup %2500 }
 0x8d5   :  { %2502 = vrcp.f32 %v1635_v8  ;;  %v1642_v62 = vadd.f32 1.0, %v2501_v21 }
 0x8d7   :  { %2504 = vrcp.f32 %v1642_v62 }
 0x8e0   :  { %v2329_v46 = vpop.f32.mrf.mxu1 }
 0x8e1   :  { %v1785_v23 = vadd.f32 %v2329_v46, %v1994_v16 }
 0x8e2   :  { %v2503_v12 = vpop.eup %2502  ;;  %v1776_v29 = vpop.f32.mrf.mxu1 }
 0x8e3   :  { %v1646_v33 = vmul.f32 %v2503_v12, %v1645_v4  ;;  %v1777_v35 = vadd.f32 %v1994_v16, %v1776_v29  ;;  %1811 = vmax.xlane.f32.xlu1 %v1785_v23 }
 0x8e4   :  { %v2330_v36 = vpop.f32.mrf.mxu1  ;;  %v2505_v56 = vpop.eup %2504 }
 0x8e5   :  { %v1647_v38 = vadd.f32 %v1646_v33, %v3381_v37  ;;  %v1788_v39 = vadd.f32 %v2330_v36, %v1994_v16  ;;  %1807 = vmax.xlane.f32.xlu0 %v1777_v35  ;;  %v1649_v43 = vsub.f32 1.0, %v2505_v56  ;;  %v1651_v44 = vmul.f32 %v2505_v56, %v3300_v14 }
 0x8e6   :  { %v1779_v40 = vpop.f32.mrf.mxu1 }
 0x8e7   :  { %2506 = vtanh.f32 %v1647_v38  ;;  %v1780_v42 = vadd.f32 %v1994_v16, %v1779_v40  ;;  %1813 = vmax.xlane.f32.xlu1 %v1788_v39 }
 0x8e9   :  { %1809 = vmax.xlane.f32.xlu0 %v1780_v42 }
 0x8f4   :  { %v2507_v9 = vpop.eup %2506 }
 0x8f5   :  { %v1650_v18 = vmul.f32 %v2507_v9, %v1649_v43 }
 0x8f7   :  { %v1652_v57 = vadd.f32 %v1651_v44, %v1650_v18 }
 0x8f9   :  { %v2013_v58 = vpack.c.bf16 %v1652_v57, %v3300_v14 }
 0x8fb   :  { %2332 = vmatmul.mubr.msk.bf16.gmra.mxu1 %vm2012_vm13, %v2013_v58 }
 0x96c   :  { %v1812_v47 = vpop.xlane.xlu1 %1811 }
 0x96d   :  { %v3328_v49 = vsub.f32 %v1785_v23, %v1812_v47 }
 0x96e   :  { %v1808_v45 = vpop.xlane.xlu0 %1807 }
 0x96f   :  { %v3326_v48 = vsub.f32 %v1777_v35, %v1808_v45  ;;  %v1835_v53 = vmul.f32 1.442695, %v3328_v49 }
 0x970   :  { %v1814_v52 = vpop.xlane.xlu1 %1813 }
 0x971   :  { %v1831_v50 = vmul.f32 1.442695, %v3326_v48  ;;  %v3334_v54 = vsub.f32 %v1788_v39, %v1814_v52 }
 0x972   :  { %v1810_v17 = vpop.xlane.xlu0 %1809 }
 0x973   :  { %v3331_v51 = vsub.f32 %v1780_v42, %v1810_v17  ;;  %2508 = vpow2.f32 %v1831_v50  ;;  %v1837_v14 = vmul.f32 1.442695, %v3334_v54 }
 0x974   :  { %2510 = vpow2.f32 %v1835_v53 }
 0x975   :  { %v1833_v55 = vmul.f32 1.442695, %v3331_v51 }
 0x977   :  { %2512 = vpow2.f32 %v1833_v55 }
 0x978   :  { %2514 = vpow2.f32 %v1837_v14 }
 0x980   :  { %v2509_v10 = vpop.eup %2508 }
 0x981   :  { %v2511_v28 = vpop.eup %2510 }
 0x984   :  { %v2513_v5 = vpop.eup %2512 }
 0x985   :  { %v2515_v24 = vpop.eup %2514 }
 0x9bb   :  { %v2333_v59 = vpop.f32.mrf.mxu1 }
 0x9bc   :  { %v1801_v20 = vadd.f32 %v2333_v59, %v1994_v16 }
 0x9bd   :  { %v1792_v6 = vpop.f32.mrf.mxu1 }
 0x9be   :  { %v1793_v15 = vadd.f32 %v1994_v16, %v1792_v6 }
 0x9bf   :  { %v2334_v13 = vpop.f32.mrf.mxu1 }
 0x9c0   :  { %1815 = vmax.xlane.f32.xlu0 %v1793_v15  ;;  %v1804_v1 = vadd.f32 %v2334_v13, %v1994_v16 }
 0x9c1   :  { %v1795_v61 = vpop.f32.mrf.mxu1 }
 0x9c2   :  { %v1796_v34 = vadd.f32 %v1994_v16, %v1795_v61 }
 0x9c4   :  { %1817 = vmax.xlane.f32.xlu1 %v1796_v34  ;;  %1819 = vmax.xlane.f32.xlu0 %v1801_v20 }
 0x9c8   :  { %1821 = vmax.xlane.f32.xlu1 %v1804_v1  ;;  %1847 = vadd.xlane.f32.xlu0 %v2509_v10 }
 0x9cc   :  { %1851 = vadd.xlane.f32.xlu0 %v2511_v28  ;;  %1849 = vadd.xlane.f32.xlu1 %v2513_v5 }
 0x9d0   :  { %1853 = vadd.xlane.f32.xlu1 %v2515_v24 }
 0xa49   :  { %v1816_v41 = vpop.xlane.xlu0 %1815 }
 0xa4a   :  { %v1827_v22 = vsub.f32 %v1793_v15, %v1816_v41 }
 0xa4c   :  { %v1839_v19 = vmul.f32 1.442695, %v1827_v22 }
 0xa4d   :  { %v1818_v11 = vpop.xlane.xlu1 %1817  ;;  %v1820_v27 = vpop.xlane.xlu0 %1819 }
 0xa4e   :  { %2516 = vpow2.f32 %v1839_v19  ;;  %v3338_v32 = vsub.f32 %v1796_v34, %v1818_v11  ;;  %v3340_v60 = vsub.f32 %v1801_v20, %v1820_v27 }
 0xa50   :  { %v1841_v2 = vmul.f32 1.442695, %v3338_v32  ;;  %v1843_v30 = vmul.f32 1.442695, %v3340_v60 }
 0xa51   :  { %v1822_v25 = vpop.xlane.xlu1 %1821  ;;  %v1848_v63 = vpop.xlane.xlu0 %1847 }
 0xa52   :  { %2518 = vpow2.f32 %v1841_v2  ;;  %v1830_v0 = vsub.f32 %v1804_v1, %v1822_v25 }
 0xa53   :  { %2520 = vpow2.f32 %v1843_v30 }
 0xa54   :  { %v1845_v3 = vmul.f32 1.442695, %v1830_v0  ;;  %2522 = vlog2.f32 %v1848_v63 }
 0xa55   :  { %v1850_v31 = vpop.xlane.xlu1 %1849  ;;  %v1852_v26 = vpop.xlane.xlu0 %1851 }
 0xa56   :  { %2524 = vpow2.f32 %v1845_v3 }
 0xa57   :  { %2526 = vlog2.f32 %v1850_v31 }
 0xa58   :  { %2528 = vlog2.f32 %v1852_v26 }
 0xa59   :  { %v1854_v7 = vpop.xlane.xlu1 %1853 }
 0xa5a   :  { %2530 = vlog2.f32 %v1854_v7 }
 0xa5b   :  { %v2517_v8 = vpop.eup %2516 }
 0xa5c   :  { %1855 = vadd.xlane.f32.xlu0 %v2517_v8 }
 0xa5f   :  { %v2519_v21 = vpop.eup %2518 }
 0xa60   :  { %v2521_v16 = vpop.eup %2520  ;;  %1857 = vadd.xlane.f32.xlu1 %v2519_v21 }
 0xa61   :  { %v2523_v62 = vpop.eup %2522  ;;  %1859 = vadd.xlane.f32.xlu0 %v2521_v16 }
 0xa62   :  { %v1864_v46 = vmul.f32 0.6931472, %v2523_v62 }
 0xa63   :  { %v2525_v4 = vpop.eup %2524 }
 0xa64   :  { %v2527_v23 = vpop.eup %2526  ;;  %v1879_v12 = vsub.f32 %v3326_v48, %v1864_v46  ;;  %1861 = vadd.xlane.f32.xlu1 %v2525_v4 }
 0xa65   :  { %v2529_v29 = vpop.eup %2528  ;;  %v1866_v33 = vmul.f32 0.6931472, %v2527_v23 }
 0xa66   :  { %1887 = vst [vmem:[#allocation17] sm:$0xff] %v1879_v12  ;;  %v1868_v35 = vmul.f32 0.6931472, %v2529_v29 }
 0xa67   :  { %v2531_v36 = vpop.eup %2530  ;;  %v1880_v37 = vsub.f32 %v3331_v51, %v1866_v33 }
 0xa68   :  { %v1881_v38 = vsub.f32 %v3328_v49, %v1868_v35  ;;  %v1870_v39 = vmul.f32 0.6931472, %v2531_v36 }
 0xa69   :  { %1888 = vst [vmem:[#allocation17 + $0x8] sm:$0xff] %v1880_v37 }
 0xa6a   :  { %1889 = vst [vmem:[#allocation17 + $0x10] sm:$0xff] %v1881_v38  ;;  %v1882_v40 = vsub.f32 %v3334_v54, %v1870_v39 }
 0xa6c   :  { %1890 = vst [vmem:[#allocation17 + $0x18] sm:$0xff] %v1882_v40 }
 0xae5   :  { %v1856_v42 = vpop.xlane.xlu0 %1855 }
 0xae6   :  { %2532 = vlog2.f32 %v1856_v42 }
 0xae9   :  { %v1858_v56 = vpop.xlane.xlu1 %1857 }
 0xaea   :  { %2534 = vlog2.f32 %v1858_v56  ;;  %v1860_v43 = vpop.xlane.xlu0 %1859 }
 0xaeb   :  { %2536 = vlog2.f32 %v1860_v43 }
 0xaed   :  { %v1862_v9 = vpop.xlane.xlu1 %1861 }
 0xaee   :  { %2538 = vlog2.f32 %v1862_v9 }
 0xaf3   :  { %v2533_v18 = vpop.eup %2532 }
 0xaf4   :  { %v1872_v44 = vmul.f32 0.6931472, %v2533_v18 }
 0xaf6   :  { %v1883_v57 = vsub.f32 %v1827_v22, %v1872_v44 }
 0xaf7   :  { %v2535_v58 = vpop.eup %2534 }
 0xaf8   :  { %v2537_v45 = vpop.eup %2536  ;;  %1891 = vst [vmem:[#allocation17 + $0x20] sm:$0xff] %v1883_v57  ;;  %v1874_v47 = vmul.f32 0.6931472, %v2535_v58 }
 0xaf9   :  { %v1876_v48 = vmul.f32 0.6931472, %v2537_v45 }
 0xafa   :  { %v1884_v17 = vsub.f32 %v3338_v32, %v1874_v47 }
 0xafb   :  { %v2539_v49 = vpop.eup %2538  ;;  %v1885_v50 = vsub.f32 %v3340_v60, %v1876_v48 }
 0xafc   :  { %1892 = vst [vmem:[#allocation17 + $0x28] sm:$0xff] %v1884_v17  ;;  %v1878_v51 = vmul.f32 0.6931472, %v2539_v49 }
 0xafd   :  { %1893 = vst [vmem:[#allocation17 + $0x30] sm:$0xff] %v1885_v50 }
 0xafe   :  { %v1886_v52 = vsub.f32 %v1830_v0, %v1878_v51 }
 0xb00   :  { %1894 = vst [vmem:[#allocation17 + $0x38] sm:$0xff] %v1886_v52 }
 0xb01   :  { %2712 = shalt.err (!%p2709_p11)
}
 0xb02   :  { %1906 = dma.vmem_to_hbm [thread:$0]  %s1901_s18, 1024, %s3367_s11, [#allocation7], %s2733_s25, %s2733_s25, %s2734_s26  }
 0xb03   :  { %2729 = dma.done.wait [#allocation7], 1024  }
 0xb04   :  { %2730 = vsyncadd [#allocation7], 4294966272 }
 0xb05   :  { %1910 = vsyncpa [#allocation6], 1 }
 0xb06   :  { %1911 = vsyncpa [#allocation9], 1 }
 0xb07   :  { %1912 = vsyncpa [#allocation12], 1 }
 0xb08   :  { %1913 = vsyncpa [#allocation15], 1 }
 0xb09   :  { %1914 = vsyncpa [#allocation7], 1 }

</bundles_post_ra>
